<compile_context>
chip_gen: v7x
topology: tpu7x:2x2x1
jax: 0.10.0
libtpu: 0.0.40
codegen_flags: <defaults>
</compile_context>

<pallas_src>
import jax
import jax.numpy as jnp
from jax.experimental import pallas as pl
from jax.experimental.pallas import tpu as pltpu


# ------------------------------- small helpers -------------------------------

def _round_up(x, m):
    return -(-x // m) * m


def _pick_tile(dim, max_tile, quantum):
    """Largest tile <= max_tile that divides `dim` (dim is a multiple of quantum)."""
    t = min(max_tile, dim)
    while dim % t:
        t -= quantum
    return t


# ----------------------------- im2col (JAX glue) -----------------------------

def _im2col_nchw(x, kh, kw, stride, pad):
    """x: (N, C, H, W) -> (patches (N, Ho*Wo, C*kh*kw), Ho, Wo).

    Patch vector ordering is (C, kh, kw), matching PyTorch OIHW weights
    flattened as weight.reshape(O, C*kh*kw).
    """
    N, C, H, W = x.shape
    xp = jnp.pad(x, ((0, 0), (0, 0), (pad, pad), (pad, pad)))
    Ho = (H + 2 * pad - kh) // stride + 1
    Wo = (W + 2 * pad - kw) // stride + 1
    rows = (jnp.arange(Ho) * stride)[:, None] + jnp.arange(kh)[None, :]
    cols = (jnp.arange(Wo) * stride)[:, None] + jnp.arange(kw)[None, :]
    patches = xp[:, :, rows[:, :, None, None], cols[None, None, :, :]]   # (N,C,Ho,kh,Wo,kw)
    patches = patches.transpose(0, 2, 4, 1, 3, 5)                        # (N,Ho,Wo,C,kh,kw)
    return patches.reshape(N, Ho * Wo, C * kh * kw), Ho, Wo


def _spatial_patches(x, kh, kw, stride, pad):
    """Channel-last gather.  x: (B, H, W, *rest) -> ((B, Ho, kh, Wo, kw, *rest), Ho, Wo)."""
    B, H, W = x.shape[0], x.shape[1], x.shape[2]
    pad_widths = ((0, 0), (pad, pad), (pad, pad)) + ((0, 0),) * (x.ndim - 3)
    xp = jnp.pad(x, pad_widths)
    Ho = (H + 2 * pad - kh) // stride + 1
    Wo = (W + 2 * pad - kw) // stride + 1
    rows = (jnp.arange(Ho) * stride)[:, None] + jnp.arange(kh)[None, :]   # (Ho, kh)
    cols = (jnp.arange(Wo) * stride)[:, None] + jnp.arange(kw)[None, :]   # (Wo, kw)
    patches = xp[:, rows[:, :, None, None], cols[None, None, :, :]]       # (B,Ho,kh,Wo,kw,*rest)
    return patches, Ho, Wo


# ------------------------------ Pallas kernels -------------------------------

def _qkv_kernel(a_ref, w_ref, o_ref):
    # a_ref: (TM, Kp) bf16, w_ref: (Kp, Np) bf16 (resident), o_ref: (TM, Np) f32
    o_ref[...] = jnp.dot(a_ref[...], w_ref[...],
                         preferred_element_type=jnp.float32).astype(o_ref.dtype)


def _qkv_acc_kernel(a_ref, w_ref, o_ref, acc_ref):
    # K-tiled path (large C): accumulate over the "arbitrary" K axis.
    @pl.when(pl.program_id(1) == 0)
    def _():
        acc_ref[...] = jnp.zeros_like(acc_ref)

    acc_ref[...] += jnp.dot(a_ref[...], w_ref[...],
                            preferred_element_type=jnp.float32)

    @pl.when(pl.program_id(1) == pl.num_programs(1) - 1)
    def _():
        o_ref[...] = acc_ref[...].astype(o_ref.dtype)


def fused_qkv_matmul(a, w, *, tm_max=256, tk_max=1024):
    """a: (M, Kp) bf16, w: (Kp, Np) bf16 -> (M, Np) f32.  Kp, Np multiples of 128."""
    M, K = a.shape
    Kw, N = w.shape
    assert K == Kw and K % 128 == 0 and N % 128 == 0

    Mp = _round_up(M, 8)
    if Mp != M:
        a = jnp.pad(a, ((0, Mp - M), (0, 0)))
    TM = _pick_tile(Mp, tm_max, 8)
    # v7x has 2 TensorCores that split "parallel" grid steps: force >= 2 steps.
    if Mp // TM < 2 and Mp >= 16:
        TM = _pick_tile(Mp, Mp // 2, 8)
    gm = Mp // TM

    flops = 2 * Mp * K * N
    bytes_ac = 2 * (Mp * K + K * N) + 4 * Mp * N

    if K <= tk_max:
        # K whole per block; weight gets a single full block whose index never
        # changes -> fetched into VMEM exactly once (resident).
        out = pl.pallas_call(
            _qkv_kernel,
            out_shape=jax.ShapeDtypeStruct((Mp, N), jnp.float32),
            grid=(gm,),
            in_specs=[
                pl.BlockSpec((TM, K), lambda i: (i, 0)),
                pl.BlockSpec((K, N), lambda i: (0, 0)),
            ],
            out_specs=pl.BlockSpec((TM, N), lambda i: (i, 0)),
            compiler_params=pltpu.CompilerParams(
                dimension_semantics=("parallel",)),
            cost_estimate=pl.CostEstimate(
                flops=flops, transcendentals=0, bytes_accessed=bytes_ac),
        )(a, w)
    else:
        # Large-C fallback: tile K ("arbitrary", last grid axis) with a VMEM
        # accumulator so per-step VMEM stays bounded on v5e/v7x.
        TK = _pick_tile(K, tk_max, 128)
        gk = K // TK
        out = pl.pallas_call(
            _qkv_acc_kernel,
            out_shape=jax.ShapeDtypeStruct((Mp, N), jnp.float32),
            grid=(gm, gk),
            in_specs=[
                pl.BlockSpec((TM, TK), lambda i, k: (i, k)),
                pl.BlockSpec((TK, N), lambda i, k: (k, 0)),
            ],
            out_specs=pl.BlockSpec((TM, N), lambda i, k: (i, 0)),
            scratch_shapes=[pltpu.VMEM((TM, N), jnp.float32)],
            compiler_params=pltpu.CompilerParams(
                dimension_semantics=("parallel", "arbitrary")),
            cost_estimate=pl.CostEstimate(
                flops=flops, transcendentals=0, bytes_accessed=bytes_ac),
        )(a, w)
    return out[:M]


def _a_stage_kernel(kf_ref, ap_ref, a_ref):
    # kf_ref: (1, C, V, KA), ap_ref: (1, C, KA, PA) -> a_ref: (1, C, V, PA)
    a_ref[0] = jnp.einsum("cvk,ckp->cvp", kf_ref[0], ap_ref[0],
                          preferred_element_type=jnp.float32)


def a_stage_matmul(kfT, apT):
    """kfT: (B, C, V, KA), apT: (B, C, KA, PA) -> (B, C, V, PA).

    Per grid step (one batch element) all C per-channel matmuls run as one
    batched einsum; output layout (C, V, PA) flattens contiguously into the
    o-stage weight, so no external transpose of `a` is needed.
    """
    B, C, V, KA = kfT.shape
    PA = apT.shape[-1]
    return pl.pallas_call(
        _a_stage_kernel,
        out_shape=jax.ShapeDtypeStruct((B, C, V, PA), jnp.float32),
        grid=(B,),
        in_specs=[
            pl.BlockSpec((1, C, V, KA), lambda b: (b, 0, 0, 0)),
            pl.BlockSpec((1, C, KA, PA), lambda b: (b, 0, 0, 0)),
        ],
        out_specs=pl.BlockSpec((1, C, V, PA), lambda b: (b, 0, 0, 0)),
        compiler_params=pltpu.CompilerParams(dimension_semantics=("parallel",)),
        cost_estimate=pl.CostEstimate(
            flops=2 * B * C * V * KA * PA,
            transcendentals=0,
            bytes_accessed=4 * (B * C * V * KA + B * C * KA * PA + B * C * V * PA)),
    )(kfT, apT)


def _o_stage_kernel(aw_ref, op_ref, o_ref):
    # aw_ref: (1, C, KO), op_ref: (1, KO, PO) -> o_ref: (1, C, PO)
    o_ref[0] = jnp.dot(aw_ref[0], op_ref[0], preferred_element_type=jnp.float32)


def o_stage_matmul(a_w, op):
    """a_w: (B, C, KO), op: (B, KO, PO) -> (B, C, PO) (already NCHW-flattened)."""
    B, C, KO = a_w.shape
    PO = op.shape[-1]
    return pl.pallas_call(
        _o_stage_kernel,
        out_shape=jax.ShapeDtypeStruct((B, C, PO), jnp.float32),
        grid=(B,),
        in_specs=[
            pl.BlockSpec((1, C, KO), lambda b: (b, 0, 0)),
            pl.BlockSpec((1, KO, PO), lambda b: (b, 0, 0)),
        ],
        out_specs=pl.BlockSpec((1, C, PO), lambda b: (b, 0, 0)),
        compiler_params=pltpu.CompilerParams(dimension_semantics=("parallel",)),
        cost_estimate=pl.CostEstimate(
            flops=2 * B * C * KO * PO,
            transcendentals=0,
            bytes_accessed=4 * (B * C * KO + B * KO * PO + B * C * PO)),
    )(a_w, op)


# ------------------------------- Module port ---------------------------------

class DyConvSelfAttPallas:
    def __init__(self, key, input_channel=3, q_channel=8, v_channel=16):
        self.C, self.Q, self.V = input_channel, q_channel, v_channel
        C, Q, V = input_channel, q_channel, v_channel
        k = jax.random.split(key, 6)
        # q_conv_params: C convs, each weight (Q, C, 7, 7), bias (Q,)
        self.q_w = jax.random.normal(k[0], (C, Q, C, 7, 7), jnp.float32)
        self.q_b = jax.random.normal(k[1], (C, Q), jnp.float32)
        # k_conv_paramss: C x V convs, each weight (Q, C, 7, 7), bias (Q,)
        self.k_w = jax.random.normal(k[2], (C, V, Q, C, 7, 7), jnp.float32)
        self.k_b = jax.random.normal(k[3], (C, V, Q), jnp.float32)
        # v_conv_param: weight (V, C, 7, 7), bias (V,)
        self.v_w = jax.random.normal(k[4], (V, C, 7, 7), jnp.float32)
        self.v_b = jax.random.normal(k[5], (V,), jnp.float32)

        # ---- precompute fused, bias-folded, lane-padded bf16 weight (once) ----
        K = C * 49
        N = C * Q + C * V * Q + V
        self.Kp = _round_up(K + 1, 128)      # +1 row for the folded bias (197 -> 256)
        self.Np = _round_up(N, 128)          # 560 -> 640
        self.N_total = N
        w_q = self.q_w.reshape(C * Q, K)
        w_k = self.k_w.reshape(C * V * Q, K)
        w_v = self.v_w.reshape(V, K)
        w_all = jnp.concatenate([w_q, w_k, w_v], axis=0).T            # (K, N)
        b_all = jnp.concatenate(
            [self.q_b.reshape(-1), self.k_b.reshape(-1), self.v_b])[None, :]
        w_aug = jnp.concatenate([w_all, b_all], axis=0)                # bias folded (K+1, N)
        self.w_all_p = jnp.pad(
            w_aug, ((0, self.Kp - (K + 1)), (0, self.Np - N))).astype(jnp.bfloat16)

        # jit the whole forward so im2col gathers / pads / casts fuse in XLA.
        self._forward = jax.jit(self._forward_impl)

    def __call__(self, x):
        return self._forward(x, self.w_all_p)

    def _forward_impl(self, x, w_all_p):
        B, C, H, W = x.shape
        Q, V = self.Q, self.V
        K = C * 49
        N = self.N_total

        # ---- q, ks, v : one im2col + ONE tiled bf16 Pallas matmul ----
        patches, H2, W2 = _im2col_nchw(x, 7, 7, stride=2, pad=3)      # (B, H2*W2, K)
        M = B * H2 * W2
        p2d = patches.reshape(M, K)
        # Folded bias column (1.0) + zero lane-pad to Kp, then bf16 cast;
        # all of this fuses with the im2col gather under jit.
        p2d = jnp.pad(p2d, ((0, 0), (0, 1)), constant_values=1.0)
        p2d = jnp.pad(p2d, ((0, 0), (0, self.Kp - K - 1)))
        p2d = p2d.astype(jnp.bfloat16)

        out_all = fused_qkv_matmul(p2d, w_all_p)                      # (M, Np) f32
        out_all = out_all[:, :N].reshape(B, H2, W2, N)

        n_q, n_k = C * Q, C * V * Q
        # Keep q/ks/v in the channel-last layout the fused matmul emits.
        q_nat = out_all[..., :n_q].reshape(B, H2, W2, C, Q)           # (B,H2,W2,C,Q)
        ks_nat = out_all[..., n_q:n_q + n_k].reshape(B, H2, W2, C, V, Q)
        v_nat = out_all[..., n_q + n_k:]                              # (B,H2,W2,V)

        # ---- a : per-(b,c) conv of q[b,c] with data-dependent kernel ks[b,c] ----
        # Contraction index KA ordered (kh, kw, qc), identical for both operands.
        qp, Ha, Wa = _spatial_patches(q_nat, H2, W2, stride=2, pad=3) # (B,Ha,kh,Wa,kw,C,Q)
        PA, KA = Ha * Wa, H2 * W2 * Q
        apT = qp.transpose(0, 5, 2, 4, 6, 1, 3).reshape(B, C, KA, PA) # (B,C,KA,PA)
        kfT = ks_nat.transpose(0, 3, 4, 1, 2, 5).reshape(B, C, V, KA) # (B,C,V,KA)
        # a/o stages stay f32 (tiny) so the bf16 error stays confined to stage 1.
        a = a_stage_matmul(kfT, apT)                                  # (B,C,V,PA)

        # ---- o : per-b conv of v[b] with data-dependent kernel a[b] ----
        vp, Ho, Wo = _spatial_patches(v_nat, Ha, Wa, stride=2, pad=3) # (B,Ho,ah,Wo,aw,V)
        KO = V * PA
        op = vp.transpose(0, 5, 2, 4, 1, 3).reshape(B, KO, Ho * Wo)   # (B,KO,PO), K-major
        a_w = a.reshape(B, C, KO)                                     # contiguous view of a
        o = o_stage_matmul(a_w, op)                                   # (B, C, PO)
        return o.reshape(B, C, Ho, Wo)                                # already NCHW


# --------------------------- pure-JAX reference ------------------------------

def _conv_ref(x, w, b=None, stride=2, pad=3):
    out = jax.lax.conv_general_dilated(
        x, w, window_strides=(stride, stride),
        padding=((pad, pad), (pad, pad)),
        dimension_numbers=("NCHW", "OIHW", "NCHW"))
    if b is not None:
        out = out + b[None, :, None, None]
    return out


def reference_forward(m, x):
    B = x.shape[0]
    C, V = m.C, m.V
    q = jnp.stack([_conv_ref(x, m.q_w[c], m.q_b[c]) for c in range(C)], axis=1)
    ks = jnp.stack(
        [jnp.stack([_conv_ref(x, m.k_w[c, vv], m.k_b[c, vv]) for vv in range(V)], axis=1)
         for c in range(C)], axis=1)
    a = jnp.stack(
        [jnp.stack([_conv_ref(q[b, c][None], ks[b, c])[0] for c in range(C)], axis=0)
         for b in range(B)], axis=0)
    v = _conv_ref(x, m.v_w, m.v_b)
    o = jnp.stack([_conv_ref(v[b][None], a[b])[0] for b in range(B)], axis=0)
    return o


# ----------------------------------- main -------------------------------------

if __name__ == "__main__":
    key = jax.random.PRNGKey(0)
    k_param, k_x = jax.random.split(key)

    # small shapes: batch=2, input_channel=4, q_channel=8, v_channel=16, spatial 16x16
    model = DyConvSelfAttPallas(k_param, input_channel=4, q_channel=8, v_channel=16)
    x = jax.random.normal(k_x, (2, 4, 16, 16), jnp.float32)

    o = jax.block_until_ready(model(x))

    o_ref = reference_forward(model, x)
    assert o.shape == o_ref.shape == (2, 4, 6, 6), (o.shape, o_ref.shape)
    rel_err = float(jnp.linalg.norm(o - o_ref) / (jnp.linalg.norm(o_ref) + 1e-6))
    # Stage-1 (q/k/v) runs with bf16 MXU operands, so allow a slightly looser
    # gate than the old all-f32 version (error stays well below this bound).
    assert rel_err < 2e-2, f"relative error too large: {rel_err}"

    print("KERNEL_OK")
</pallas_src>

<mosaic_0001>
module attributes {stable_mosaic.version = 11 : i64} {
  func.func @_qkv_kernel(%arg0: i32, %arg1: memref<64x256xbf16, #tpu.memory_space<vmem>>, %arg2: memref<256x640xbf16, #tpu.memory_space<vmem>>, %arg3: memref<64x640xf32, #tpu.memory_space<vmem>>) attributes {dimension_semantics = [#tpu.dimension_semantics<parallel>], iteration_bounds = array<i64: 2>, scalar_prefetch = 0 : i64, scratch_operands = 0 : i64, tpu.core_type = #tpu.core_type<tc>, window_params = [{transform_indices = @transform_0, window_bounds = array<i64: 64, 256>}, {pipeline_mode = #tpu.pipeline_mode<synchronous>, transform_indices = @transform_1, window_bounds = array<i64: 256, 640>}, {transform_indices = @transform_2, window_bounds = array<i64: 64, 640>}]} {
    %c0 = arith.constant 0 : index
    %c0_0 = arith.constant 0 : index
    %0 = vector.load %arg1[%c0, %c0_0] : memref<64x256xbf16, #tpu.memory_space<vmem>>, vector<64x256xbf16>
    %c0_1 = arith.constant 0 : index
    %c0_2 = arith.constant 0 : index
    %1 = vector.load %arg2[%c0_1, %c0_2] : memref<256x640xbf16, #tpu.memory_space<vmem>>, vector<256x640xbf16>
    %cst = arith.constant dense<0.000000e+00> : vector<64x640xf32>
    %2 = tpu.matmul %0, %1, %cst {dimension_numbers = #tpu.dot_dimension_numbers<[1], [0], [0], [1], [0, 0, 1, 1], [], []>} : vector<64x256xbf16>, vector<256x640xbf16>, vector<64x640xf32> -> vector<64x640xf32>
    %c0_3 = arith.constant 0 : index
    %c0_4 = arith.constant 0 : index
    %3 = vector.load %arg3[%c0_3, %c0_4] : memref<64x640xf32, #tpu.memory_space<vmem>>, vector<64x640xf32>
    tpu.vector_store %arg3[%c0_3, %c0_4], %2 {strides = array<i32>} : memref<64x640xf32, #tpu.memory_space<vmem>>, vector<64x640xf32>,
    return
  }
  func.func @transform_0(%arg0: i32) -> (i32, i32) {
    %c0_i32 = arith.constant 0 : i32
    %c0_i32_0 = arith.constant 0 : i32
    return %arg0, %c0_i32 : i32, i32
  }
  func.func @transform_1(%arg0: i32) -> (i32, i32) {
    %c0_i32 = arith.constant 0 : i32
    %c0_i32_0 = arith.constant 0 : i32
    %c0_i32_1 = arith.constant 0 : i32
    return %c0_i32, %c0_i32_0 : i32, i32
  }
  func.func @transform_2(%arg0: i32) -> (i32, i32) {
    %c0_i32 = arith.constant 0 : i32
    %c0_i32_0 = arith.constant 0 : i32
    return %arg0, %c0_i32 : i32, i32
  }
}

module attributes {stable_mosaic.version = 11 : i64} {
  func.func @_a_stage_kernel(%arg0: i32, %arg1: memref<1x4x16x512xf32, #tpu.memory_space<vmem>>, %arg2: memref<1x4x512x16xf32, #tpu.memory_space<vmem>>, %arg3: memref<1x4x16x16xf32, #tpu.memory_space<vmem>>) attributes {dimension_semantics = [#tpu.dimension_semantics<parallel>], iteration_bounds = array<i64: 2>, scalar_prefetch = 0 : i64, scratch_operands = 0 : i64, tpu.core_type = #tpu.core_type<tc>, window_params = [{transform_indices = @transform_0, window_bounds = array<i64: 1, 4, 16, 512>}, {transform_indices = @transform_1, window_bounds = array<i64: 1, 4, 512, 16>}, {transform_indices = @transform_2, window_bounds = array<i64: 1, 4, 16, 16>}]} {
    %c0 = arith.constant 0 : index
    %c0_0 = arith.constant 0 : index
    %c0_1 = arith.constant 0 : index
    %c0_2 = arith.constant 0 : index
    %0 = vector.load %arg1[%c0, %c0_0, %c0_1, %c0_2] : memref<1x4x16x512xf32, #tpu.memory_space<vmem>>, vector<1x4x16x512xf32>
    %1 = vector.shape_cast %0 : vector<1x4x16x512xf32> to vector<4x16x512xf32>
    %c0_3 = arith.constant 0 : index
    %c0_4 = arith.constant 0 : index
    %c0_5 = arith.constant 0 : index
    %c0_6 = arith.constant 0 : index
    %2 = vector.load %arg2[%c0_3, %c0_4, %c0_5, %c0_6] : memref<1x4x512x16xf32, #tpu.memory_space<vmem>>, vector<1x4x512x16xf32>
    %3 = vector.shape_cast %2 : vector<1x4x512x16xf32> to vector<4x512x16xf32>
    "tpu.trace_start"() <{level = 10 : i32, message = "cvk,ckp->cvp"}> : () -> ()
    %cst = arith.constant dense<0.000000e+00> : vector<4x16x16xf32>
    %4 = tpu.matmul %1, %3, %cst {dimension_numbers = #tpu.dot_dimension_numbers<[2], [1], [1], [2], [0, 0, 0, 1, 1, 2], [0], [0]>} : vector<4x16x512xf32>, vector<4x512x16xf32>, vector<4x16x16xf32> -> vector<4x16x16xf32>
    "tpu.trace_stop"() : () -> ()
    %c0_7 = arith.constant 0 : index
    %c0_8 = arith.constant 0 : index
    %c0_9 = arith.constant 0 : index
    %c0_10 = arith.constant 0 : index
    %5 = vector.load %arg3[%c0_7, %c0_8, %c0_9, %c0_10] : memref<1x4x16x16xf32, #tpu.memory_space<vmem>>, vector<1x4x16x16xf32>
    %6 = vector.shape_cast %5 : vector<1x4x16x16xf32> to vector<4x16x16xf32>
    %7 = vector.shape_cast %4 : vector<4x16x16xf32> to vector<1x4x16x16xf32>
    tpu.vector_store %arg3[%c0_7, %c0_8, %c0_9, %c0_10], %7 {strides = array<i32>} : memref<1x4x16x16xf32, #tpu.memory_space<vmem>>, vector<1x4x16x16xf32>,
    return
  }
  func.func @transform_0(%arg0: i32) -> (i32, i32, i32, i32) {
    %c0_i32 = arith.constant 0 : i32
    %c0_i32_0 = arith.constant 0 : i32
    %c0_i32_1 = arith.constant 0 : i32
    %c0_i32_2 = arith.constant 0 : i32
    return %arg0, %c0_i32, %c0_i32_0, %c0_i32_1 : i32, i32, i32, i32
  }
  func.func @transform_1(%arg0: i32) -> (i32, i32, i32, i32) {
    %c0_i32 = arith.constant 0 : i32
    %c0_i32_0 = arith.constant 0 : i32
    %c0_i32_1 = arith.constant 0 : i32
    %c0_i32_2 = arith.constant 0 : i32
    return %arg0, %c0_i32, %c0_i32_0, %c0_i32_1 : i32, i32, i32, i32
  }
  func.func @transform_2(%arg0: i32) -> (i32, i32, i32, i32) {
    %c0_i32 = arith.constant 0 : i32
    %c0_i32_0 = arith.constant 0 : i32
    %c0_i32_1 = arith.constant 0 : i32
    %c0_i32_2 = arith.constant 0 : i32
    return %arg0, %c0_i32, %c0_i32_0, %c0_i32_1 : i32, i32, i32, i32
  }
}

module attributes {stable_mosaic.version = 11 : i64} {
  func.func @_o_stage_kernel(%arg0: i32, %arg1: memref<1x4x256xf32, #tpu.memory_space<vmem>>, %arg2: memref<1x256x36xf32, #tpu.memory_space<vmem>>, %arg3: memref<1x4x36xf32, #tpu.memory_space<vmem>>) attributes {dimension_semantics = [#tpu.dimension_semantics<parallel>], iteration_bounds = array<i64: 2>, scalar_prefetch = 0 : i64, scratch_operands = 0 : i64, tpu.core_type = #tpu.core_type<tc>, window_params = [{transform_indices = @transform_0, window_bounds = array<i64: 1, 4, 256>}, {transform_indices = @transform_1, window_bounds = array<i64: 1, 256, 36>}, {transform_indices = @transform_2, window_bounds = array<i64: 1, 4, 36>}]} {
    %c0 = arith.constant 0 : index
    %c0_0 = arith.constant 0 : index
    %c0_1 = arith.constant 0 : index
    %0 = vector.load %arg1[%c0, %c0_0, %c0_1] : memref<1x4x256xf32, #tpu.memory_space<vmem>>, vector<1x4x256xf32>
    %1 = vector.shape_cast %0 : vector<1x4x256xf32> to vector<4x256xf32>
    %c0_2 = arith.constant 0 : index
    %c0_3 = arith.constant 0 : index
    %c0_4 = arith.constant 0 : index
    %2 = vector.load %arg2[%c0_2, %c0_3, %c0_4] : memref<1x256x36xf32, #tpu.memory_space<vmem>>, vector<1x256x36xf32>
    %3 = vector.shape_cast %2 : vector<1x256x36xf32> to vector<256x36xf32>
    %cst = arith.constant dense<0.000000e+00> : vector<4x36xf32>
    %4 = tpu.matmul %1, %3, %cst {dimension_numbers = #tpu.dot_dimension_numbers<[1], [0], [0], [1], [0, 0, 1, 1], [], []>} : vector<4x256xf32>, vector<256x36xf32>, vector<4x36xf32> -> vector<4x36xf32>
    %c0_5 = arith.constant 0 : index
    %c0_6 = arith.constant 0 : index
    %c0_7 = arith.constant 0 : index
    %5 = vector.load %arg3[%c0_5, %c0_6, %c0_7] : memref<1x4x36xf32, #tpu.memory_space<vmem>>, vector<1x4x36xf32>
    %6 = vector.shape_cast %5 : vector<1x4x36xf32> to vector<4x36xf32>
    %7 = vector.shape_cast %4 : vector<4x36xf32> to vector<1x4x36xf32>
    tpu.vector_store %arg3[%c0_5, %c0_6, %c0_7], %7 {strides = array<i32>} : memref<1x4x36xf32, #tpu.memory_space<vmem>>, vector<1x4x36xf32>,
    return
  }
  func.func @transform_0(%arg0: i32) -> (i32, i32, i32) {
    %c0_i32 = arith.constant 0 : i32
    %c0_i32_0 = arith.constant 0 : i32
    %c0_i32_1 = arith.constant 0 : i32
    return %arg0, %c0_i32, %c0_i32_0 : i32, i32, i32
  }
  func.func @transform_1(%arg0: i32) -> (i32, i32, i32) {
    %c0_i32 = arith.constant 0 : i32
    %c0_i32_0 = arith.constant 0 : i32
    %c0_i32_1 = arith.constant 0 : i32
    return %arg0, %c0_i32, %c0_i32_0 : i32, i32, i32
  }
  func.func @transform_2(%arg0: i32) -> (i32, i32, i32) {
    %c0_i32 = arith.constant 0 : i32
    %c0_i32_0 = arith.constant 0 : i32
    %c0_i32_1 = arith.constant 0 : i32
    return %arg0, %c0_i32, %c0_i32_0 : i32, i32, i32
  }
}

</mosaic_0001>

<bundles_post_ra>
// kernel: _forward_impl.3
= control target key start
LH: loop header
LB: loop body
LE: loop exit
PB: predicated region body
PF: predicated region fallthrough
CT: control target
= control target key end

     0   :  { %s1335_s9 = smov 0   ;;  %s1665_s0 = inlined_call_operand.vmem [shape: bf16[128,256], index: 0, kind: input, shape index: {}]   ;;  %s1666_s1 = inlined_call_operand.vmem [shape: bf16[256,640], index: 1, kind: input, shape index: {}]   ;;  %s1667_s2 = inlined_call_operand.vmem [shape: f32[128,640], index: 2, kind: output, shape index: {}]  }
   0x1 LB: > { %s1022_s10 = sadd.s32 4294967295, %s1318_s9   ;;  %p1026_p0 = scmp.ge.s32.totalorder %s1318_s9, 1  ;;  %s1318_s9 = sphi %s1335_s9, %s12_s9  }
   0x2   : > { %p114_p1 = scmp.lt.s32.totalorder %s1318_s9, 3 }
   0x4   : > { %p115_p2 = pnand %p1026_p0, %p114_p1 }
   0x5   : > { %v1188_v0 = vld [vmem:[%s1666_s1 + $0x4] ss:$20 sps:$4 sm:$0xff] (!%p115_p2)   ;;  %v1190_v1 = vld [vmem:[%s1666_s1 + $0xc] ss:$20 sps:$4 sm:$0xff] (!%p115_p2)   ;;  %v1193_v3 = vld [vmem:[%s1666_s1 + $0x8] ss:$20 sps:$4 sm:$0xff] (!%p115_p2)  }
   0x6   : > { %118 = sbr.rel (%p115_p2) target bundleno = 328 (0x148), region = 28  ;;  %713 = vmatprep.subr.bf16.mxu0 (!%p115_p2), %v1188_v0  ;;  %v1192_v2 = vld [vmem:[%s1666_s1] ss:$20 sps:$4 sm:$0xff] (!%p115_p2)   ;;  %786 = vmatprep.subr.bf16.mxu1 (!%p115_p2), %v1190_v1  ;;  %v1198_v6 = vld [vmem:[%s1666_s1 + $0x28] ss:$20 sps:$4 sm:$0xff] (!%p115_p2)   ;;  %s1027_s19 = sshll.u32 (!%p115_p2), %s1022_s10, 3 }
   0x7   : > { %v1194_v4 = vld [vmem:[%s1666_s1 + $0x2c] ss:$20 sps:$4 sm:$0xff] (!%p115_p2)   ;;  %714 = vmatpush1.bf16.msra.mxu0 (!%p115_p2), %v1192_v2  ;;  %787 = vmatpush1.bf16.msra.mxu1 (!%p115_p2), %v1193_v3  ;;  %v1196_v5 = vld [vmem:[%s1666_s1 + $0x34] ss:$20 sps:$4 sm:$0xff] (!%p115_p2)   ;;  %v1199_v7 = vld [vmem:[%s1666_s1 + $0x30] ss:$20 sps:$4 sm:$0xff] (!%p115_p2)  }
   0x8   : > { %715 = vmatprep.subr.bf16.mxu0 (!%p115_p2), %v1194_v4  ;;  %788 = vmatprep.subr.bf16.mxu1 (!%p115_p2), %v1196_v5  ;;  %v1200_v8 = vld [vmem:[%s1666_s1 + $0x54] ss:$20 sps:$4 sm:$0xff] (!%p115_p2)   ;;  %v1202_v9 = vld [vmem:[%s1666_s1 + $0x5c] ss:$20 sps:$4 sm:$0xff] (!%p115_p2)   ;;  %v1205_v11 = vld [vmem:[%s1666_s1 + $0x58] ss:$20 sps:$4 sm:$0xff] (!%p115_p2)  }
   0x9   : > { %v1204_v10 = vld [vmem:[%s1666_s1 + $0x50] ss:$20 sps:$4 sm:$0xff] (!%p115_p2)   ;;  %v1210_v14 = vld [vmem:[%s1666_s1 + $0x78] ss:$20 sps:$4 sm:$0xff] (!%p115_p2)   ;;  %v1211_v15 = vld [vmem:[%s1666_s1 + $0x80] ss:$20 sps:$4 sm:$0xff] (!%p115_p2)  }
   0xa   : > { %v1206_v12 = vld [vmem:[%s1666_s1 + $0x7c] ss:$20 sps:$4 sm:$0xff] (!%p115_p2)   ;;  %v1208_v13 = vld [vmem:[%s1666_s1 + $0x84] ss:$20 sps:$4 sm:$0xff] (!%p115_p2)   ;;  %v1214_v17 = vld [vmem:[%s1666_s1 + $0xac] ss:$20 sps:$4 sm:$0xff] (!%p115_p2)  }
   0xb   : > { %716 = vmatpush1.bf16.msra.mxu0 (!%p115_p2), %v1198_v6  ;;  %789 = vmatpush1.bf16.msra.mxu1 (!%p115_p2), %v1199_v7  ;;  %v1212_v16 = vld [vmem:[%s1666_s1 + $0xa4] ss:$20 sps:$4 sm:$0xff] (!%p115_p2)   ;;  %v1216_v18 = vld [vmem:[%s1666_s1 + $0xa0] ss:$20 sps:$4 sm:$0xff] (!%p115_p2)   ;;  %v1217_v19 = vld [vmem:[%s1666_s1 + $0xa8] ss:$20 sps:$4 sm:$0xff] (!%p115_p2)  }
   0xc   : > { %717 = vmatprep.subr.bf16.mxu0 (!%p115_p2), %v1200_v8  ;;  %790 = vmatprep.subr.bf16.mxu1 (!%p115_p2), %v1202_v9  ;;  %v1218_v20 = vld [vmem:[%s1666_s1 + $0xcc] ss:$20 sps:$4 sm:$0xff] (!%p115_p2)   ;;  %v1220_v21 = vld [vmem:[%s1666_s1 + $0xd4] ss:$20 sps:$4 sm:$0xff] (!%p115_p2)   ;;  %v1223_v23 = vld [vmem:[%s1666_s1 + $0xd0] ss:$20 sps:$4 sm:$0xff] (!%p115_p2)  }
   0xd   : > { %v1222_v22 = vld [vmem:[%s1666_s1 + $0xc8] ss:$20 sps:$4 sm:$0xff]   ;;  %v1228_v26 = vld [vmem:[%s1666_s1 + $0xf0] ss:$20 sps:$4 sm:$0xff]   ;;  %v1229_v27 = vld [vmem:[%s1666_s1 + $0xf8] ss:$20 sps:$4 sm:$0xff]  }
   0xe   : > { %v1224_v24 = vld [vmem:[%s1666_s1 + $0xf4] ss:$20 sps:$4 sm:$0xff]   ;;  %v1226_v25 = vld [vmem:[%s1666_s1 + $0xfc] ss:$20 sps:$4 sm:$0xff]   ;;  %v1232_v29 = vld [vmem:[%s1666_s1 + $0x124] ss:$20 sps:$4 sm:$0xff]  }
   0xf   : > { %718 = vmatpush1.bf16.msra.mxu0 %v1204_v10  ;;  %791 = vmatpush1.bf16.msra.mxu1 %v1205_v11  ;;  %v1230_v28 = vld [vmem:[%s1666_s1 + $0x11c] ss:$20 sps:$4 sm:$0xff]   ;;  %v1234_v30 = vld [vmem:[%s1666_s1 + $0x118] ss:$20 sps:$4 sm:$0xff]   ;;  %v1235_v31 = vld [vmem:[%s1666_s1 + $0x120] ss:$20 sps:$4 sm:$0xff]  }
  0x10   : > { %719 = vmatprep.subr.bf16.mxu0 %v1206_v12  ;;  %792 = vmatprep.subr.bf16.mxu1 %v1208_v13  ;;  %v1236_v32 = vld [vmem:[%s1666_s1 + $0x144] ss:$20 sps:$4 sm:$0xff]   ;;  %v1238_v33 = vld [vmem:[%s1666_s1 + $0x14c] ss:$20 sps:$4 sm:$0xff]   ;;  %p139_p3 = scmp.lt.s32.totalorder %s1027_s19, 15 }
  0x11   : > { %v1240_v34 = vld [vmem:[%s1666_s1 + $0x140] ss:$20 sps:$4 sm:$0xff]   ;;  %v1241_v35 = vld [vmem:[%s1666_s1 + $0x148] ss:$20 sps:$4 sm:$0xff]   ;;  %v1247_v39 = vld [vmem:[%s1666_s1 + $0x170] ss:$20 sps:$4 sm:$0xff]  }
  0x12   : > { %v1242_v36 = vld [vmem:[%s1666_s1 + $0x16c] ss:$20 sps:$4 sm:$0xff]   ;;  %v1244_v37 = vld [vmem:[%s1666_s1 + $0x174] ss:$20 sps:$4 sm:$0xff]   ;;  %s1669_s19 = smov (!%p139_p3, %s1027_s19), 15 }
  0x13   : > { %720 = vmatpush1.bf16.msra.mxu0 %v1210_v14  ;;  %793 = vmatpush1.bf16.msra.mxu1 %v1211_v15  ;;  %v1246_v38 = vld [vmem:[%s1666_s1 + $0x168] ss:$20 sps:$4 sm:$0xff]   ;;  %s1122_s17 = sshll.u32 %s1669_s19, 3  ;;  %v1252_v42 = vld [vmem:[%s1666_s1 + $0x190] ss:$20 sps:$4 sm:$0xff]  }
  0x14   : > { %721 = vmatprep.subr.bf16.mxu0 %v1212_v16  ;;  %794 = vmatprep.subr.bf16.mxu1 %v1214_v17  ;;  %v1248_v40 = vld [vmem:[%s1666_s1 + $0x194] ss:$20 sps:$4 sm:$0xff]   ;;  %v1250_v41 = vld [vmem:[%s1666_s1 + $0x19c] ss:$20 sps:$4 sm:$0xff]   ;;  %v1253_v43 = vld [vmem:[%s1666_s1 + $0x198] ss:$20 sps:$4 sm:$0xff]   ;;  %s1486_s27 = scalar_lea.vmem %s1665_s0, %s1122_s17 }
  0x15   : > { %v1254_v44 = vld [vmem:[%s1666_s1 + $0x1bc] ss:$20 sps:$4 sm:$0xff]   ;;  %v1256_v45 = vld [vmem:[%s1666_s1 + $0x1c4] ss:$20 sps:$4 sm:$0xff]   ;;  %v1259_v47 = vld [vmem:[%s1666_s1 + $0x1c0] ss:$20 sps:$4 sm:$0xff]  }
  0x16   : > { %v1258_v46 = vld [vmem:[%s1666_s1 + $0x1b8] ss:$20 sps:$4 sm:$0xff]   ;;  %v1264_v51 = vld [vmem:[%s1666_s1 + $0x1e0] ss:$20 sps:$4 sm:$0xff]   ;;  %v1265_v52 = vld [vmem:[%s1666_s1 + $0x1e8] ss:$20 sps:$4 sm:$0xff]  }
  0x17   : > { %722 = vmatpush1.bf16.msra.mxu0 %v1216_v18  ;;  %795 = vmatpush1.bf16.msra.mxu1 %v1217_v19  ;;  %v1498_v48 = vld [vmem:[%s1486_s27 + $0x4] ss:$8 sps:$4 sm:$0xff]   ;;  %v1268_v54 = vld [vmem:[%s1666_s1 + $0x214] ss:$20 sps:$4 sm:$0xff]   ;;  %v1274_v58 = vld [vmem:[%s1666_s1 + $0x23c] ss:$20 sps:$4 sm:$0xff]  }
  0x18   : > { %723 = vmatprep.subr.bf16.mxu0 %v1218_v20  ;;  %796 = vmatprep.subr.bf16.mxu1 %v1220_v21  ;;  %v1260_v49 = vld [vmem:[%s1666_s1 + $0x1e4] ss:$20 sps:$4 sm:$0xff]   ;;  %v1262_v50 = vld [vmem:[%s1666_s1 + $0x1ec] ss:$20 sps:$4 sm:$0xff]   ;;  %v1270_v55 = vld [vmem:[%s1666_s1 + $0x208] ss:$20 sps:$4 sm:$0xff]  }
  0x19   : > { %745 = vmatprep.mubr.bf16.mxu0 %v1498_v48  ;;  %818 = vmatprep.mubr.bf16.mxu1 %v1498_v48  ;;  %v1266_v53 = vld [vmem:[%s1666_s1 + $0x20c] ss:$20 sps:$4 sm:$0xff]   ;;  %v1271_v56 = vld [vmem:[%s1666_s1 + $0x210] ss:$20 sps:$4 sm:$0xff]   ;;  %v1272_v57 = vld [vmem:[%s1666_s1 + $0x234] ss:$20 sps:$4 sm:$0xff]  }
  0x1a   : > { %v1276_v59 = vld [vmem:[%s1666_s1 + $0x230] ss:$20 sps:$4 sm:$0xff]   ;;  %v1277_v60 = vld [vmem:[%s1666_s1 + $0x238] ss:$20 sps:$4 sm:$0xff]   ;;  %v1283_v0 = vld [vmem:[%s1666_s1 + $0x260] ss:$20 sps:$4 sm:$0xff]  }
  0x1b   : > { %724 = vmatpush1.bf16.msra.mxu0 %v1222_v22  ;;  %797 = vmatpush1.bf16.msra.mxu1 %v1223_v23  ;;  %v1278_v61 = vld [vmem:[%s1666_s1 + $0x25c] ss:$20 sps:$4 sm:$0xff]   ;;  %v1280_v62 = vld [vmem:[%s1666_s1 + $0x264] ss:$20 sps:$4 sm:$0xff]   ;;  %v1554_v2 = vld [vmem:[%s1486_s27] ss:$8 sps:$4 sm:$0xff]  }
  0x1c   : > { %725 = vmatprep.subr.bf16.mxu0 %v1224_v24  ;;  %798 = vmatprep.subr.bf16.mxu1 %v1226_v25  ;;  %v1282_v63 = vld [vmem:[%s1666_s1 + $0x258] ss:$20 sps:$4 sm:$0xff]   ;;  %v1287_v1 = vld [vmem:[%s1666_s1 + $0x150] ss:$20 sps:$4 sm:$0xff]   ;;  %v1563_v5 = vld [vmem:[%s1486_s27 + $0x14] ss:$8 sps:$4 sm:$0xff]  }
  0x1d   : > { %v1288_v3 = vld [vmem:[%s1666_s1 + $0x10] ss:$20 sps:$4 sm:$0xff]   ;;  %v1289_v4 = vld [vmem:[%s1666_s1 + $0x178] ss:$20 sps:$4 sm:$0xff]   ;;  %v1294_v7 = vld [vmem:[%s1666_s1 + $0x1a0] ss:$20 sps:$4 sm:$0xff]  }
  0x1e   : > { %v1290_v6 = vld [vmem:[%s1666_s1 + $0x38] ss:$20 sps:$4 sm:$0xff]   ;;  %v1295_v9 = vld [vmem:[%s1666_s1 + $0x60] ss:$20 sps:$4 sm:$0xff]   ;;  %v1296_v10 = vld [vmem:[%s1666_s1 + $0x1c8] ss:$20 sps:$4 sm:$0xff]  }
  0x1f   : > { %726 = vmatpush1.bf16.msra.mxu0 %v1228_v26  ;;  %799 = vmatpush1.bf16.msra.mxu1 %v1229_v27  ;;  %v1293_v8 = vld [vmem:[%s1486_s27 + $0x10] ss:$8 sps:$4 sm:$0xff]   ;;  %v1298_v11 = vld [vmem:[%s1486_s27 + $0x24] ss:$8 sps:$4 sm:$0xff]   ;;  %v1297_v12 = vld [vmem:[%s1666_s1 + $0x88] ss:$20 sps:$4 sm:$0xff]  }
  0x20   : > { %727 = vmatprep.subr.bf16.mxu0 %v1230_v28  ;;  %800 = vmatprep.subr.bf16.mxu1 %v1232_v29  ;;  %v1301_v13 = vld [vmem:[%s1666_s1 + $0x1f0] ss:$20 sps:$4 sm:$0xff]   ;;  %v1300_v14 = vld [vmem:[%s1486_s27 + $0x20] ss:$8 sps:$4 sm:$0xff]   ;;  %v1303_v16 = vld [vmem:[%s1666_s1 + $0x218] ss:$20 sps:$4 sm:$0xff]  }
  0x21   : > { %v1302_v15 = vld [vmem:[%s1666_s1 + $0xb0] ss:$20 sps:$4 sm:$0xff]   ;;  %v1305_v17 = vld [vmem:[%s1486_s27 + $0x34] ss:$8 sps:$4 sm:$0xff]   ;;  %v1304_v18 = vld [vmem:[%s1666_s1 + $0xd8] ss:$20 sps:$4 sm:$0xff]  }
  0x22   : > { %v1308_v19 = vld [vmem:[%s1666_s1 + $0x240] ss:$20 sps:$4 sm:$0xff]   ;;  %v1307_v20 = vld [vmem:[%s1486_s27 + $0x30] ss:$8 sps:$4 sm:$0xff]   ;;  %v1310_v22 = vld [vmem:[%s1666_s1 + $0x268] ss:$20 sps:$4 sm:$0xff]  }
  0x23   : > { %728 = vmatpush1.bf16.msra.mxu0 %v1234_v30  ;;  %801 = vmatpush1.bf16.msra.mxu1 %v1235_v31  ;;  %v1309_v21 = vld [vmem:[%s1666_s1 + $0x100] ss:$20 sps:$4 sm:$0xff]   ;;  %v1311_v23 = vld [vmem:[%s1666_s1 + $0x128] ss:$20 sps:$4 sm:$0xff]   ;;  %s1179_s27 = smul.u32 40, %s1669_s19 }
  0x24   : > { %729 = vmatprep.subr.bf16.mxu0 %v1236_v32  ;;  %802 = vmatprep.subr.bf16.mxu1 %v1238_v33 }
  0x25   : > { %s1620_s24 = scalar_lea.vmem %s1667_s2, %s1179_s27 }
  0x27   : > { %730 = vmatpush1.bf16.msra.mxu0 %v1240_v34  ;;  %803 = vmatpush1.bf16.msra.mxu1 %v1241_v35 }
  0x28   : > { %731 = vmatprep.subr.bf16.mxu0 %v1242_v36  ;;  %804 = vmatprep.subr.bf16.mxu1 %v1244_v37 }
  0x2b   : > { %732 = vmatpush1.bf16.msra.mxu0 %v1246_v38  ;;  %805 = vmatpush1.bf16.msra.mxu1 %v1247_v39 }
  0x2c   : > { %733 = vmatprep.subr.bf16.mxu0 %v1248_v40  ;;  %806 = vmatprep.subr.bf16.mxu1 %v1250_v41 }
  0x2f   : > { %734 = vmatpush1.bf16.msra.mxu0 %v1252_v42  ;;  %807 = vmatpush1.bf16.msra.mxu1 %v1253_v43 }
  0x30   : > { %735 = vmatprep.subr.bf16.mxu0 %v1254_v44  ;;  %808 = vmatprep.subr.bf16.mxu1 %v1256_v45 }
  0x33   : > { %736 = vmatpush1.bf16.msra.mxu0 %v1258_v46  ;;  %809 = vmatpush1.bf16.msra.mxu1 %v1259_v47 }
  0x34   : > { %737 = vmatprep.subr.bf16.mxu0 %v1260_v49  ;;  %810 = vmatprep.subr.bf16.mxu1 %v1262_v50 }
  0x37   : > { %738 = vmatpush1.bf16.msra.mxu0 %v1264_v51  ;;  %811 = vmatpush1.bf16.msra.mxu1 %v1265_v52 }
  0x38   : > { %739 = vmatprep.subr.bf16.mxu0 %v1266_v53  ;;  %812 = vmatprep.subr.bf16.mxu1 %v1268_v54 }
  0x3b   : > { %740 = vmatpush1.bf16.msra.mxu0 %v1270_v55  ;;  %813 = vmatpush1.bf16.msra.mxu1 %v1271_v56 }
  0x3c   : > { %741 = vmatprep.subr.bf16.mxu0 %v1272_v57  ;;  %814 = vmatprep.subr.bf16.mxu1 %v1274_v58 }
  0x3f   : > { %742 = vmatpush1.bf16.msra.mxu0 %v1276_v59  ;;  %815 = vmatpush1.bf16.msra.mxu1 %v1277_v60 }
  0x40   : > { %743 = vmatprep.subr.bf16.mxu0 %v1278_v61  ;;  %816 = vmatprep.subr.bf16.mxu1 %v1280_v62 }
  0x43   : > { %744 = vmatpush1.bf16.msra.mxu0 %v1282_v63  ;;  %817 = vmatpush1.bf16.msra.mxu1 %v1283_v0 }
  0x44   : > { %1123 = vmatprep.subr.bf16.mxu0 %v1287_v1  ;;  %1163 = vmatprep.subr.bf16.mxu1 %v1287_v1 }
  0x46   : > { %746 = vmatmul.mubr.bf16.vlgmr.msra.gmra.mrb[0].mxu0 %v1554_v2  ;;  %819 = vmatmul.mubr.bf16.vlgmr.msra.gmra.mrb[0].mxu1 %v1554_v2 }
  0x47   : > { %1124 = vmatpush3.bf16.msra.mxu0 %v1288_v3  ;;  %1171 = vmatpush3.bf16.msra.mxu1 %v1288_v3 }
  0x48   : > { %1125 = vmatprep.subr.bf16.mxu0 %v1289_v4  ;;  %1164 = vmatprep.subr.bf16.mxu1 %v1289_v4 }
  0x49   : > { %755 = vmatprep.mubr.bf16.mxu0 %v1563_v5  ;;  %828 = vmatprep.mubr.bf16.mxu1 %v1563_v5 }
  0x4b   : > { %1126 = vmatpush3.bf16.msra.mxu0 %v1290_v6  ;;  %1172 = vmatpush3.bf16.msra.mxu1 %v1290_v6 }
  0x4c   : > { %1127 = vmatprep.subr.bf16.mxu0 %v1294_v7  ;;  %1165 = vmatprep.subr.bf16.mxu1 %v1294_v7 }
  0x4e   : > { %756 = vmatmul.mubr.bf16.gmra.mrb[4].mxu0 %v1293_v8  ;;  %829 = vmatmul.mubr.bf16.gmra.mrb[4].mxu1 %v1293_v8 }
  0x4f   : > { %1128 = vmatpush3.bf16.msra.mxu0 %v1295_v9  ;;  %1173 = vmatpush3.bf16.msra.mxu1 %v1295_v9 }
  0x50   : > { %1129 = vmatprep.subr.bf16.mxu0 %v1296_v10  ;;  %1166 = vmatprep.subr.bf16.mxu1 %v1296_v10 }
  0x51   : > { %765 = vmatprep.mubr.bf16.mxu0 %v1298_v11  ;;  %838 = vmatprep.mubr.bf16.mxu1 %v1298_v11 }
  0x53   : > { %1130 = vmatpush3.bf16.msra.mxu0 %v1297_v12  ;;  %1174 = vmatpush3.bf16.msra.mxu1 %v1297_v12 }
  0x54   : > { %1131 = vmatprep.subr.bf16.mxu0 %v1301_v13  ;;  %1167 = vmatprep.subr.bf16.mxu1 %v1301_v13 }
  0x56   : > { %766 = vmatmul.mubr.bf16.gmra.mrb[8].mxu0 %v1300_v14  ;;  %839 = vmatmul.mubr.bf16.gmra.mrb[8].mxu1 %v1300_v14 }
  0x57   : > { %1132 = vmatpush3.bf16.msra.mxu0 %v1302_v15  ;;  %1175 = vmatpush3.bf16.msra.mxu1 %v1302_v15 }
  0x58   : > { %1133 = vmatprep.subr.bf16.mxu0 %v1303_v16  ;;  %1168 = vmatprep.subr.bf16.mxu1 %v1303_v16 }
  0x59   : > { %775 = vmatprep.mubr.bf16.mxu0 %v1305_v17  ;;  %848 = vmatprep.mubr.bf16.mxu1 %v1305_v17 }
  0x5b   : > { %1134 = vmatpush3.bf16.msra.mxu0 %v1304_v18  ;;  %1176 = vmatpush3.bf16.msra.mxu1 %v1304_v18 }
  0x5c   : > { %1135 = vmatprep.subr.bf16.mxu0 %v1308_v19  ;;  %1169 = vmatprep.subr.bf16.mxu1 %v1308_v19 }
  0x5e   : > { %776 = vmatmul.mubr.bf16.gmra.mrb[12].mxu0 %v1307_v20  ;;  %849 = vmatmul.mubr.bf16.gmra.mrb[12].mxu1 %v1307_v20 }
  0x5f   : > { %1136 = vmatpush3.bf16.msra.mxu0 %v1309_v21  ;;  %1177 = vmatpush3.bf16.msra.mxu1 %v1309_v21 }
  0x60   : > { %1137 = vmatprep.subr.bf16.mxu0 %v1310_v22  ;;  %1170 = vmatprep.subr.bf16.mxu1 %v1310_v22 }
  0x61   : > { %891 = vmatprep.mubr.bf16.mxu0 %v1498_v48  ;;  %907 = vmatprep.mubr.bf16.mxu1 %v1298_v11 }
  0x63   : > { %1138 = vmatpush3.bf16.msra.mxu0 %v1311_v23  ;;  %1178 = vmatpush3.bf16.msra.mxu1 %v1311_v23 }
  0x66   : > { %892 = vmatmul.mubr.bf16.vlgmr.msra.gmra.mrb[16].mxu0 %v1554_v2  ;;  %908 = vmatmul.mubr.bf16.vlgmr.msra.gmra.mrb[16].mxu1 %v1300_v14 }
  0x67   : > { %899 = vmatprep.mubr.bf16.mxu0 %v1563_v5  ;;  %915 = vmatprep.mubr.bf16.mxu1 %v1305_v17 }
  0x6e   : > { %900 = vmatmul.mubr.bf16.gmra.mrb[20].mxu0 %v1293_v8  ;;  %916 = vmatmul.mubr.bf16.gmra.mrb[20].mxu1 %v1307_v20 }
 0x119   : > { %v747_v24 = vpop.f32.mrb[0].mxu0  ;;  %v820_v25 = vpop.f32.mrb[0].mxu1 }
 0x11a   : > { %924 = vst [vmem:[%s1620_s24] sm:$0xff] %v747_v24  ;;  %926 = vst [vmem:[%s1620_s24 + $0x10] sm:$0xff] %v820_v25  ;;  %v749_v26 = vpop.f32.mrb[1].mxu0  ;;  %v822_v27 = vpop.f32.mrb[1].mxu1 }
 0x11b   : > { %925 = vst [vmem:[%s1620_s24 + $0x8] sm:$0xff] %v749_v26  ;;  %927 = vst [vmem:[%s1620_s24 + $0x18] sm:$0xff] %v822_v27  ;;  %v751_v28 = vpop.f32.mrb[2].mxu0  ;;  %v824_v29 = vpop.f32.mrb[2].mxu1 }
 0x11c   : > { %929 = vst [vmem:[%s1620_s24 + $0x28] sm:$0xff] %v751_v28  ;;  %931 = vst [vmem:[%s1620_s24 + $0x38] sm:$0xff] %v824_v29  ;;  %v753_v30 = vpop.f32.mrb[3].mxu0  ;;  %v826_v31 = vpop.f32.mrb[3].mxu1 }
 0x11d   : > { %930 = vst [vmem:[%s1620_s24 + $0x30] sm:$0xff] %v753_v30  ;;  %932 = vst [vmem:[%s1620_s24 + $0x40] sm:$0xff] %v826_v31 }
 0x121   : > { %v757_v32 = vpop.f32.mrb[4].mxu0  ;;  %v830_v33 = vpop.f32.mrb[4].mxu1 }
 0x122   : > { %934 = vst [vmem:[%s1620_s24 + $0x50] sm:$0xff] %v757_v32  ;;  %936 = vst [vmem:[%s1620_s24 + $0x60] sm:$0xff] %v830_v33  ;;  %v759_v34 = vpop.f32.mrb[5].mxu0  ;;  %v832_v35 = vpop.f32.mrb[5].mxu1 }
 0x123   : > { %935 = vst [vmem:[%s1620_s24 + $0x58] sm:$0xff] %v759_v34  ;;  %937 = vst [vmem:[%s1620_s24 + $0x68] sm:$0xff] %v832_v35  ;;  %v761_v36 = vpop.f32.mrb[6].mxu0  ;;  %v834_v37 = vpop.f32.mrb[6].mxu1 }
 0x124   : > { %939 = vst [vmem:[%s1620_s24 + $0x78] sm:$0xff] %v761_v36  ;;  %941 = vst [vmem:[%s1620_s24 + $0x88] sm:$0xff] %v834_v37  ;;  %v763_v38 = vpop.f32.mrb[7].mxu0  ;;  %v836_v39 = vpop.f32.mrb[7].mxu1 }
 0x125   : > { %940 = vst [vmem:[%s1620_s24 + $0x80] sm:$0xff] %v763_v38  ;;  %942 = vst [vmem:[%s1620_s24 + $0x90] sm:$0xff] %v836_v39 }
 0x129   : > { %v767_v40 = vpop.f32.mrb[8].mxu0  ;;  %v840_v41 = vpop.f32.mrb[8].mxu1 }
 0x12a   : > { %944 = vst [vmem:[%s1620_s24 + $0xa0] sm:$0xff] %v767_v40  ;;  %946 = vst [vmem:[%s1620_s24 + $0xb0] sm:$0xff] %v840_v41  ;;  %v769_v42 = vpop.f32.mrb[9].mxu0  ;;  %v842_v43 = vpop.f32.mrb[9].mxu1 }
 0x12b   : > { %945 = vst [vmem:[%s1620_s24 + $0xa8] sm:$0xff] %v769_v42  ;;  %947 = vst [vmem:[%s1620_s24 + $0xb8] sm:$0xff] %v842_v43  ;;  %v771_v44 = vpop.f32.mrb[10].mxu0  ;;  %v844_v45 = vpop.f32.mrb[10].mxu1 }
 0x12c   : > { %949 = vst [vmem:[%s1620_s24 + $0xc8] sm:$0xff] %v771_v44  ;;  %951 = vst [vmem:[%s1620_s24 + $0xd8] sm:$0xff] %v844_v45  ;;  %v773_v46 = vpop.f32.mrb[11].mxu0  ;;  %v846_v47 = vpop.f32.mrb[11].mxu1 }
 0x12d   : > { %950 = vst [vmem:[%s1620_s24 + $0xd0] sm:$0xff] %v773_v46  ;;  %952 = vst [vmem:[%s1620_s24 + $0xe0] sm:$0xff] %v846_v47 }
 0x131   : > { %v777_v48 = vpop.f32.mrb[12].mxu0  ;;  %v850_v49 = vpop.f32.mrb[12].mxu1 }
 0x132   : > { %954 = vst [vmem:[%s1620_s24 + $0xf0] sm:$0xff] %v777_v48  ;;  %956 = vst [vmem:[%s1620_s24 + $0x100] sm:$0xff] %v850_v49  ;;  %v779_v50 = vpop.f32.mrb[13].mxu0  ;;  %v852_v51 = vpop.f32.mrb[13].mxu1 }
 0x133   : > { %955 = vst [vmem:[%s1620_s24 + $0xf8] sm:$0xff] %v779_v50  ;;  %957 = vst [vmem:[%s1620_s24 + $0x108] sm:$0xff] %v852_v51  ;;  %v781_v52 = vpop.f32.mrb[14].mxu0  ;;  %v854_v53 = vpop.f32.mrb[14].mxu1 }
 0x134   : > { %959 = vst [vmem:[%s1620_s24 + $0x118] sm:$0xff] %v781_v52  ;;  %961 = vst [vmem:[%s1620_s24 + $0x128] sm:$0xff] %v854_v53  ;;  %v783_v54 = vpop.f32.mrb[15].mxu0  ;;  %v856_v55 = vpop.f32.mrb[15].mxu1 }
 0x135   : > { %960 = vst [vmem:[%s1620_s24 + $0x120] sm:$0xff] %v783_v54  ;;  %962 = vst [vmem:[%s1620_s24 + $0x130] sm:$0xff] %v856_v55 }
 0x139   : > { %v1139_v56 = vpop.f32.mrb[16].mxu0  ;;  %v1151_v57 = vpop.f32.mrb[16].mxu1 }
 0x13a   : > { %v1140_v58 = vpop.f32.mrb[17].mxu0  ;;  %v1152_v59 = vpop.f32.mrb[17].mxu1 }
 0x13b   : > { %v1141_v60 = vadd.f32 %v1140_v58, %v1139_v56  ;;  %v1153_v61 = vadd.f32 %v1152_v59, %v1151_v57  ;;  %v1142_v62 = vpop.f32.mrb[18].mxu0  ;;  %v1154_v63 = vpop.f32.mrb[18].mxu1 }
 0x13c   : > { %v1143_v0 = vpop.f32.mrb[19].mxu0  ;;  %v1155_v1 = vpop.f32.mrb[19].mxu1 }
 0x13d   : > { %928 = vst [vmem:[%s1620_s24 + $0x20] sm:$0xff] %v1141_v60  ;;  %948 = vst [vmem:[%s1620_s24 + $0xc0] sm:$0xff] %v1153_v61  ;;  %v1144_v2 = vadd.f32 %v1143_v0, %v1142_v62  ;;  %v1156_v3 = vadd.f32 %v1155_v1, %v1154_v63 }
 0x13f   : > { %933 = vst [vmem:[%s1620_s24 + $0x48] sm:$0xff] %v1144_v2  ;;  %953 = vst [vmem:[%s1620_s24 + $0xe8] sm:$0xff] %v1156_v3 }
 0x141   : > { %v1145_v4 = vpop.f32.mrb[20].mxu0  ;;  %v1157_v5 = vpop.f32.mrb[20].mxu1 }
 0x142   : > { %v1146_v6 = vpop.f32.mrb[21].mxu0  ;;  %v1158_v7 = vpop.f32.mrb[21].mxu1 }
 0x143   : > { %v1147_v8 = vadd.f32 %v1146_v6, %v1145_v4  ;;  %v1159_v9 = vadd.f32 %v1158_v7, %v1157_v5  ;;  %v1148_v10 = vpop.f32.mrb[22].mxu0  ;;  %v1160_v11 = vpop.f32.mrb[22].mxu1 }
 0x144   : > { %v1149_v12 = vpop.f32.mrb[23].mxu0  ;;  %v1161_v13 = vpop.f32.mrb[23].mxu1 }
 0x145   : > { %938 = vst [vmem:[%s1620_s24 + $0x70] sm:$0xff] %v1147_v8  ;;  %958 = vst [vmem:[%s1620_s24 + $0x110] sm:$0xff] %v1159_v9  ;;  %v1150_v14 = vadd.f32 %v1149_v12, %v1148_v10  ;;  %v1162_v15 = vadd.f32 %v1161_v13, %v1160_v11 }
 0x147   : > { %943 = vst [vmem:[%s1620_s24 + $0x98] sm:$0xff] %v1150_v14  ;;  %963 = vst [vmem:[%s1620_s24 + $0x138] sm:$0xff] %v1162_v15 }
 0x148 PF: > { %s12_s9 = sadd.s32 1, %s1318_s9  }
 0x149   : > { %p9_p4 = scmp.ge.s32.totalorder %s12_s9, 4  }
 0x14b   :  { %11 = sbr.rel (!%p9_p4) target bundleno = 1 (0x1), region = 58 }

// kernel: _forward_impl.4
= control target key start
LH: loop header
LB: loop body
LE: loop exit
PB: predicated region body
PF: predicated region fallthrough
CT: control target
= control target key end

     0   :  { %s1735_s9 = smov 0   ;;  %s2070_s0 = inlined_call_operand.vmem [shape: f32[2,4,16,512], index: 0, kind: input, shape index: {}]   ;;  %s2071_s1 = inlined_call_operand.vmem [shape: f32[2,4,512,16], index: 1, kind: input, shape index: {}]   ;;  %s2072_s2 = inlined_call_operand.vmem [shape: f32[2,4,16,16], index: 2, kind: output, shape index: {}]  }
   0x1 LB: > { %s1128_s10 = sadd.s32 4294967295, %s1718_s9   ;;  %p1132_p0 = scmp.ge.s32.totalorder %s1718_s9, 1  ;;  %s1718_s9 = sphi %s1735_s9, %s12_s9  }
   0x2   : > { %p122_p1 = scmp.lt.s32.totalorder %s1718_s9, 3 }
   0x4   : > { %p123_p2 = pnand %p1132_p0, %p122_p1 }
   0x5   : > { %p149_p3 = scmp.lt.s32.totalorder (!%p123_p2), %s1128_s10, 1  ;;  %vm1052_vm0 = vcmask (!%p123_p2), 130048  }
   0x6   : > { %126 = sbr.rel (%p123_p2) target bundleno = 371 (0x173), region = 28 }
   0xd   : > { %s2074_s10 = smov (!%p149_p3, %s1128_s10), 1 }
   0xe   : > { %s1142_s11 = sshll.u32 %s2074_s10, 11  ;;  %s1141_s15 = sshll.u32 %s2074_s10, 8 }
   0xf   : > { %s1749_s14 = scalar_lea.vmem %s2071_s1, %s1142_s11  ;;  %s1805_s18 = scalar_lea.vmem %s2070_s0, %s1141_s15 }
  0x10   : > { %v212_v0 = vld [vmem:[%s1749_s14 + $0x80] sm:$0xff]  ;;  %v213_v1 = vld [vmem:[%s1749_s14 + $0x88] sm:$0xff]  ;;  %v214_v11 = vld [vmem:[%s1749_s14 + $0x90] sm:$0xff]  ;;  %s1143_s19 = sshll.u32 %s2074_s10, 6 }
  0x11   : > { %v244_v2 = vld [vmem:[%s1749_s14 + $0x180] sm:$0xff]  ;;  %v1448_v3 = vpack.c.bf16 %v213_v1, %v212_v0  ;;  %v245_v4 = vld [vmem:[%s1749_s14 + $0x188] sm:$0xff]  ;;  %v215_v13 = vld [vmem:[%s1749_s14 + $0x98] sm:$0xff]  ;;  %s2049_s22 = scalar_lea.vmem %s2072_s2, %s1143_s19 }
  0x12   : > { %v196_v5 = vld [vmem:[%s1749_s14] sm:$0xff]  ;;  %v197_v6 = vld [vmem:[%s1749_s14 + $0x8] sm:$0xff]  ;;  %v1480_v7 = vpack.c.bf16 %v245_v4, %v244_v2  ;;  %v246_v14 = vld [vmem:[%s1749_s14 + $0x190] sm:$0xff]  ;;  %v1452_v16 = vpack.c.bf16 %v215_v13, %v214_v11 }
  0x13   : > { %v1450_v8 = vpack.c.bf16 %v197_v6, %v196_v5  ;;  %v228_v9 = vld [vmem:[%s1749_s14 + $0x100] sm:$0xff]  ;;  %v229_v10 = vld [vmem:[%s1749_s14 + $0x108] sm:$0xff]  ;;  %1449 = vmatprep.subr.bf16.mxu0 %v1448_v3  ;;  %v247_v15 = vld [vmem:[%s1749_s14 + $0x198] sm:$0xff] }
  0x14   : > { %v1482_v12 = vpack.c.bf16 %v229_v10, %v228_v9  ;;  %1481 = vmatprep.subr.bf16.mxu1 %v1480_v7  ;;  %v1484_v17 = vpack.c.bf16 %v247_v15, %v246_v14  ;;  %v198_v18 = vld [vmem:[%s1749_s14 + $0x10] sm:$0xff]  ;;  %v199_v19 = vld [vmem:[%s1749_s14 + $0x18] sm:$0xff]  ;;  %v216_v23 = vld [vmem:[%s1749_s14 + $0xa0] sm:$0xff] }
  0x15   : > { %1451 = vmatpush3.bf16.msra.mxu0 %v1450_v8  ;;  %v230_v20 = vld [vmem:[%s1749_s14 + $0x110] sm:$0xff]  ;;  %v1454_v21 = vpack.c.bf16 %v199_v19, %v198_v18  ;;  %v231_v22 = vld [vmem:[%s1749_s14 + $0x118] sm:$0xff]  ;;  %v217_v24 = vld [vmem:[%s1749_s14 + $0xa8] sm:$0xff] }
  0x16   : > { %1483 = vmatpush3.bf16.msra.mxu1 %v1482_v12  ;;  %1453 = vmatprep.subr.bf16.mxu0 %v1452_v16  ;;  %v1486_v25 = vpack.c.bf16 %v231_v22, %v230_v20  ;;  %v1456_v26 = vpack.c.bf16 %v217_v24, %v216_v23  ;;  %v248_v27 = vld [vmem:[%s1749_s14 + $0x1a0] sm:$0xff]  ;;  %v249_v28 = vld [vmem:[%s1749_s14 + $0x1a8] sm:$0xff]  ;;  %v218_v35 = vld [vmem:[%s1749_s14 + $0xb0] sm:$0xff] }
  0x17   : > { %1485 = vmatprep.subr.bf16.mxu1 %v1484_v17  ;;  %v200_v29 = vld [vmem:[%s1749_s14 + $0x20] sm:$0xff]  ;;  %v1488_v30 = vpack.c.bf16 %v249_v28, %v248_v27  ;;  %v201_v31 = vld [vmem:[%s1749_s14 + $0x28] sm:$0xff]  ;;  %v219_v36 = vld [vmem:[%s1749_s14 + $0xb8] sm:$0xff] }
  0x18   : > { %v232_v32 = vld [vmem:[%s1749_s14 + $0x120] sm:$0xff]  ;;  %v233_v33 = vld [vmem:[%s1749_s14 + $0x128] sm:$0xff]  ;;  %v1458_v34 = vpack.c.bf16 %v201_v31, %v200_v29  ;;  %v250_v37 = vld [vmem:[%s1749_s14 + $0x1b0] sm:$0xff]  ;;  %v1460_v39 = vpack.c.bf16 %v219_v36, %v218_v35 }
  0x19   : > { %1455 = vmatpush3.bf16.msra.mxu0 %v1454_v21  ;;  %v1490_v38 = vpack.c.bf16 %v233_v33, %v232_v32  ;;  %v251_v40 = vld [vmem:[%s1749_s14 + $0x1b8] sm:$0xff]  ;;  %v202_v41 = vld [vmem:[%s1749_s14 + $0x30] sm:$0xff]  ;;  %v220_v46 = vld [vmem:[%s1749_s14 + $0xc0] sm:$0xff] }
  0x1a   : > { %1487 = vmatpush3.bf16.msra.mxu1 %v1486_v25  ;;  %1457 = vmatprep.subr.bf16.mxu0 %v1456_v26  ;;  %v203_v42 = vld [vmem:[%s1749_s14 + $0x38] sm:$0xff]  ;;  %v1492_v43 = vpack.c.bf16 %v251_v40, %v250_v37  ;;  %v234_v44 = vld [vmem:[%s1749_s14 + $0x130] sm:$0xff]  ;;  %v221_v47 = vld [vmem:[%s1749_s14 + $0xc8] sm:$0xff] }
  0x1b   : > { %1489 = vmatprep.subr.bf16.mxu1 %v1488_v30  ;;  %v235_v45 = vld [vmem:[%s1749_s14 + $0x138] sm:$0xff]  ;;  %v252_v48 = vld [vmem:[%s1749_s14 + $0x1c0] sm:$0xff]  ;;  %v253_v49 = vld [vmem:[%s1749_s14 + $0x1c8] sm:$0xff]  ;;  %v1462_v50 = vpack.c.bf16 %v203_v42, %v202_v41  ;;  %v1464_v52 = vpack.c.bf16 %v221_v47, %v220_v46 }
  0x1c   : > { %v1494_v51 = vpack.c.bf16 %v235_v45, %v234_v44  ;;  %v204_v53 = vld [vmem:[%s1749_s14 + $0x40] sm:$0xff]  ;;  %v205_v54 = vld [vmem:[%s1749_s14 + $0x48] sm:$0xff]  ;;  %v1496_v56 = vpack.c.bf16 %v253_v49, %v252_v48  ;;  %v222_v58 = vld [vmem:[%s1749_s14 + $0xd0] sm:$0xff] }
  0x1d   : > { %1459 = vmatpush3.bf16.msra.mxu0 %v1458_v34  ;;  %v236_v55 = vld [vmem:[%s1749_s14 + $0x140] sm:$0xff]  ;;  %v237_v57 = vld [vmem:[%s1749_s14 + $0x148] sm:$0xff]  ;;  %v223_v59 = vld [vmem:[%s1749_s14 + $0xd8] sm:$0xff]  ;;  %v1466_v62 = vpack.c.bf16 %v205_v54, %v204_v53 }
  0x1e   : > { %1491 = vmatpush3.bf16.msra.mxu1 %v1490_v38  ;;  %1461 = vmatprep.subr.bf16.mxu0 %v1460_v39  ;;  %v254_v60 = vld [vmem:[%s1749_s14 + $0x1d0] sm:$0xff]  ;;  %v255_v61 = vld [vmem:[%s1749_s14 + $0x1d8] sm:$0xff]  ;;  %v1498_v63 = vpack.c.bf16 %v237_v57, %v236_v55  ;;  %v1468_v0 = vpack.c.bf16 %v223_v59, %v222_v58  ;;  %v224_v6 = vld [vmem:[%s1749_s14 + $0xe0] sm:$0xff] }
  0x1f   : > { %1493 = vmatprep.subr.bf16.mxu1 %v1492_v43  ;;  %v206_v1 = vld [vmem:[%s1749_s14 + $0x50] sm:$0xff]  ;;  %v207_v2 = vld [vmem:[%s1749_s14 + $0x58] sm:$0xff]  ;;  %v1500_v4 = vpack.c.bf16 %v255_v61, %v254_v60  ;;  %v225_v7 = vld [vmem:[%s1749_s14 + $0xe8] sm:$0xff] }
  0x20   : > { %v238_v3 = vld [vmem:[%s1749_s14 + $0x150] sm:$0xff]  ;;  %v239_v5 = vld [vmem:[%s1749_s14 + $0x158] sm:$0xff]  ;;  %v256_v8 = vld [vmem:[%s1749_s14 + $0x1e0] sm:$0xff]  ;;  %v1470_v10 = vpack.c.bf16 %v207_v2, %v206_v1  ;;  %v1472_v14 = vpack.c.bf16 %v225_v7, %v224_v6 }
  0x21   : > { %1463 = vmatpush3.bf16.msra.mxu0 %v1462_v50  ;;  %v257_v9 = vld [vmem:[%s1749_s14 + $0x1e8] sm:$0xff]  ;;  %v208_v11 = vld [vmem:[%s1749_s14 + $0x60] sm:$0xff]  ;;  %v1502_v13 = vpack.c.bf16 %v239_v5, %v238_v3  ;;  %v167_v17 = vld [vmem:[%s1805_s18 + $0x18] sm:$0xff] }
  0x22   : > { %1495 = vmatpush3.bf16.msra.mxu1 %v1494_v51  ;;  %1465 = vmatprep.subr.bf16.mxu0 %v1464_v52  ;;  %v209_v12 = vld [vmem:[%s1749_s14 + $0x68] sm:$0xff]  ;;  %v240_v15 = vld [vmem:[%s1749_s14 + $0x160] sm:$0xff]  ;;  %v1504_v18 = vpack.c.bf16 %v257_v9, %v256_v8  ;;  %v226_v20 = vld [vmem:[%s1749_s14 + $0xf0] sm:$0xff] }
  0x23   : > { %1497 = vmatprep.subr.bf16.mxu1 %v1496_v56  ;;  %v165_v16 = vld [vmem:[%s1805_s18 + $0x8] sm:$0xff]  ;;  %v227_v21 = vld [vmem:[%s1749_s14 + $0xf8] sm:$0xff]  ;;  %v258_v22 = vld [vmem:[%s1749_s14 + $0x1f0] sm:$0xff]  ;;  %591 = vmatprep.mubr.f32.mxu1 %v167_v17  ;;  %v1474_v24 = vpack.c.bf16 %v209_v12, %v208_v11 }
  0x24   : > { %v241_v19 = vld [vmem:[%s1749_s14 + $0x168] sm:$0xff]  ;;  %516 = vmatprep.mubr.f32.mxu0 %v165_v16  ;;  %v259_v23 = vld [vmem:[%s1749_s14 + $0x1f8] sm:$0xff]  ;;  %v1476_v26 = vpack.c.bf16 %v227_v21, %v226_v20  ;;  %v210_v27 = vld [vmem:[%s1749_s14 + $0x70] sm:$0xff] }
  0x25   : > { %1467 = vmatpush3.bf16.msra.mxu0 %v1466_v62  ;;  %v1506_v25 = vpack.c.bf16 %v241_v19, %v240_v15  ;;  %v211_v28 = vld [vmem:[%s1749_s14 + $0x78] sm:$0xff]  ;;  %v242_v29 = vld [vmem:[%s1749_s14 + $0x170] sm:$0xff]  ;;  %v1508_v30 = vpack.c.bf16 %v259_v23, %v258_v22  ;;  %v276_v32 = vld [vmem:[%s1749_s14 + $0x280] sm:$0xff] }
  0x26   : > { %1499 = vmatpush3.bf16.msra.mxu1 %v1498_v63  ;;  %1469 = vmatprep.subr.bf16.mxu0 %v1468_v0  ;;  %v243_v31 = vld [vmem:[%s1749_s14 + $0x178] sm:$0xff]  ;;  %v277_v33 = vld [vmem:[%s1749_s14 + $0x288] sm:$0xff]  ;;  %v308_v34 = vld [vmem:[%s1749_s14 + $0x380] sm:$0xff]  ;;  %v1478_v36 = vpack.c.bf16 %v211_v28, %v210_v27 }
  0x27   : > { %1501 = vmatprep.subr.bf16.mxu1 %v1500_v4  ;;  %v309_v35 = vld [vmem:[%s1749_s14 + $0x388] sm:$0xff]  ;;  %v1510_v37 = vpack.c.bf16 %v243_v31, %v242_v29  ;;  %v1512_v38 = vpack.c.bf16 %v277_v33, %v276_v32  ;;  %v260_v39 = vld [vmem:[%s1749_s14 + $0x200] sm:$0xff]  ;;  %v278_v44 = vld [vmem:[%s1749_s14 + $0x290] sm:$0xff] }
  0x28   : > { %v261_v40 = vld [vmem:[%s1749_s14 + $0x208] sm:$0xff]  ;;  %v292_v41 = vld [vmem:[%s1749_s14 + $0x300] sm:$0xff]  ;;  %v1544_v42 = vpack.c.bf16 %v309_v35, %v308_v34  ;;  %v279_v45 = vld [vmem:[%s1749_s14 + $0x298] sm:$0xff] }
  0x29   : > { %1471 = vmatpush3.bf16.msra.mxu0 %v1470_v10  ;;  %v293_v43 = vld [vmem:[%s1749_s14 + $0x308] sm:$0xff]  ;;  %v310_v46 = vld [vmem:[%s1749_s14 + $0x390] sm:$0xff]  ;;  %v311_v47 = vld [vmem:[%s1749_s14 + $0x398] sm:$0xff]  ;;  %v1514_v50 = vpack.c.bf16 %v261_v40, %v260_v39  ;;  %v1516_v52 = vpack.c.bf16 %v279_v45, %v278_v44 }
  0x2a   : > { %1503 = vmatpush3.bf16.msra.mxu1 %v1502_v13  ;;  %1473 = vmatprep.subr.bf16.mxu0 %v1472_v14  ;;  %v164_v48 = vld [vmem:[%s1805_s18] sm:$0xff]  ;;  %v166_v49 = vld [vmem:[%s1805_s18 + $0x10] sm:$0xff]  ;;  %v1546_v51 = vpack.c.bf16 %v293_v43, %v292_v41  ;;  %v263_v54 = vld [vmem:[%s1749_s14 + $0x218] sm:$0xff]  ;;  %v1548_v56 = vpack.c.bf16 %v311_v47, %v310_v46 }
  0x2b   : > { %1505 = vmatprep.subr.bf16.mxu1 %v1504_v18  ;;  %v262_v53 = vld [vmem:[%s1749_s14 + $0x210] sm:$0xff]  ;;  %v295_v57 = vld [vmem:[%s1749_s14 + $0x318] sm:$0xff]  ;;  %v280_v58 = vld [vmem:[%s1749_s14 + $0x2a0] sm:$0xff] }
  0x2c   : > { %v294_v55 = vld [vmem:[%s1749_s14 + $0x310] sm:$0xff]  ;;  %v281_v59 = vld [vmem:[%s1749_s14 + $0x2a8] sm:$0xff]  ;;  %v312_v60 = vld [vmem:[%s1749_s14 + $0x3a0] sm:$0xff]  ;;  %v1518_v62 = vpack.c.bf16 %v263_v54, %v262_v53 }
  0x2d   : > { %1475 = vmatpush3.bf16.msra.mxu0 %v1474_v24  ;;  %v313_v61 = vld [vmem:[%s1749_s14 + $0x3a8] sm:$0xff]  ;;  %v1550_v63 = vpack.c.bf16 %v295_v57, %v294_v55  ;;  %v1520_v0 = vpack.c.bf16 %v281_v59, %v280_v58  ;;  %v264_v1 = vld [vmem:[%s1749_s14 + $0x220] sm:$0xff]  ;;  %v282_v6 = vld [vmem:[%s1749_s14 + $0x2b0] sm:$0xff] }
  0x2e   : > { %1507 = vmatpush3.bf16.msra.mxu1 %v1506_v25  ;;  %1477 = vmatprep.subr.bf16.mxu0 %v1476_v26  ;;  %v265_v2 = vld [vmem:[%s1749_s14 + $0x228] sm:$0xff]  ;;  %v296_v3 = vld [vmem:[%s1749_s14 + $0x320] sm:$0xff]  ;;  %v1552_v4 = vpack.c.bf16 %v313_v61, %v312_v60  ;;  %v283_v7 = vld [vmem:[%s1749_s14 + $0x2b8] sm:$0xff] }
  0x2f   : > { %1509 = vmatprep.subr.bf16.mxu1 %v1508_v30  ;;  %v297_v5 = vld [vmem:[%s1749_s14 + $0x328] sm:$0xff]  ;;  %v314_v8 = vld [vmem:[%s1749_s14 + $0x3b0] sm:$0xff]  ;;  %v315_v9 = vld [vmem:[%s1749_s14 + $0x3b8] sm:$0xff]  ;;  %v1522_v11 = vpack.c.bf16 %v265_v2, %v264_v1  ;;  %v1524_v16 = vpack.c.bf16 %v283_v7, %v282_v6 }
  0x30   : > { %v266_v10 = vld [vmem:[%s1749_s14 + $0x230] sm:$0xff]  ;;  %v267_v12 = vld [vmem:[%s1749_s14 + $0x238] sm:$0xff]  ;;  %v1554_v15 = vpack.c.bf16 %v297_v5, %v296_v3  ;;  %v284_v17 = vld [vmem:[%s1749_s14 + $0x2c0] sm:$0xff]  ;;  %v1556_v20 = vpack.c.bf16 %v315_v9, %v314_v8 }
  0x31   : > { %1479 = vmatpush3.bf16.msra.mxu0 %v1478_v36  ;;  %v298_v13 = vld [vmem:[%s1749_s14 + $0x330] sm:$0xff]  ;;  %v299_v14 = vld [vmem:[%s1749_s14 + $0x338] sm:$0xff]  ;;  %v169_v18 = vld [vmem:[%s1805_s18 + $0x28] sm:$0xff]  ;;  %v1526_v26 = vpack.c.bf16 %v267_v12, %v266_v10 }
  0x32   : > { %1511 = vmatpush3.bf16.msra.mxu1 %v1510_v37  ;;  %1513 = vmatprep.subr.bf16.mxu0 %v1512_v38  ;;  %v171_v19 = vld [vmem:[%s1805_s18 + $0x38] sm:$0xff]  ;;  %v285_v21 = vld [vmem:[%s1749_s14 + $0x2c8] sm:$0xff]  ;;  %v168_v22 = vld [vmem:[%s1805_s18 + $0x20] sm:$0xff]  ;;  %v1558_v29 = vpack.c.bf16 %v299_v14, %v298_v13 }
  0x33   : > { %1545 = vmatprep.subr.bf16.mxu1 %v1544_v42  ;;  %v170_v23 = vld [vmem:[%s1805_s18 + $0x30] sm:$0xff]  ;;  %v316_v24 = vld [vmem:[%s1749_s14 + $0x3c0] sm:$0xff]  ;;  %v317_v25 = vld [vmem:[%s1749_s14 + $0x3c8] sm:$0xff]  ;;  %v1528_v30 = vpack.c.bf16 %v285_v21, %v284_v17 }
  0x34   : > { %517 = vmatmul.mubr.f32.vlgmr.msra.gmra.mrb[0].mxu0 %v164_v48  ;;  %v268_v27 = vld [vmem:[%s1749_s14 + $0x240] sm:$0xff]  ;;  %v269_v28 = vld [vmem:[%s1749_s14 + $0x248] sm:$0xff]  ;;  %v175_v33 = vld [vmem:[%s1805_s18 + $0x58] sm:$0xff]  ;;  %v1560_v34 = vpack.c.bf16 %v317_v25, %v316_v24 }
  0x35   : > { %592 = vmatmul.mubr.f32.vlgmr.msra.gmra.mrb[0].mxu1 %v166_v49  ;;  %1515 = vmatpush3.bf16.msra.mxu0 %v1514_v50  ;;  %v300_v31 = vld [vmem:[%s1749_s14 + $0x340] sm:$0xff]  ;;  %v173_v32 = vld [vmem:[%s1805_s18 + $0x48] sm:$0xff]  ;;  %v286_v36 = vld [vmem:[%s1749_s14 + $0x2d0] sm:$0xff]  ;;  %v1530_v40 = vpack.c.bf16 %v269_v28, %v268_v27 }
  0x36   : > { %1547 = vmatpush3.bf16.msra.mxu1 %v1546_v51  ;;  %1517 = vmatprep.subr.bf16.mxu0 %v1516_v52  ;;  %v301_v35 = vld [vmem:[%s1749_s14 + $0x348] sm:$0xff]  ;;  %v287_v37 = vld [vmem:[%s1749_s14 + $0x2d8] sm:$0xff]  ;;  %v318_v38 = vld [vmem:[%s1749_s14 + $0x3d0] sm:$0xff] }
  0x37   : > { %1549 = vmatprep.subr.bf16.mxu1 %v1548_v56  ;;  %521 = vmatprep.mubr.f32.mxu0 %v169_v18  ;;  %v319_v39 = vld [vmem:[%s1749_s14 + $0x3d8] sm:$0xff]  ;;  %v1562_v41 = vpack.c.bf16 %v301_v35, %v300_v31  ;;  %v1532_v42 = vpack.c.bf16 %v287_v37, %v286_v36  ;;  %v270_v43 = vld [vmem:[%s1749_s14 + $0x250] sm:$0xff]  ;;  %v288_v48 = vld [vmem:[%s1749_s14 + $0x2e0] sm:$0xff] }
  0x38   : > { %596 = vmatprep.mubr.f32.mxu1 %v171_v19  ;;  %522 = vmatmul.mubr.f32.gmra.mrb[2].mxu0 %v168_v22  ;;  %v271_v44 = vld [vmem:[%s1749_s14 + $0x258] sm:$0xff]  ;;  %v302_v45 = vld [vmem:[%s1749_s14 + $0x350] sm:$0xff]  ;;  %v1564_v46 = vpack.c.bf16 %v319_v39, %v318_v38  ;;  %v289_v49 = vld [vmem:[%s1749_s14 + $0x2e8] sm:$0xff] }
  0x39   : > { %1519 = vmatpush3.bf16.msra.mxu0 %v1518_v62  ;;  %597 = vmatmul.mubr.f32.gmra.mrb[2].mxu1 %v170_v23  ;;  %v303_v47 = vld [vmem:[%s1749_s14 + $0x358] sm:$0xff]  ;;  %v320_v50 = vld [vmem:[%s1749_s14 + $0x3e0] sm:$0xff]  ;;  %v321_v51 = vld [vmem:[%s1749_s14 + $0x3e8] sm:$0xff]  ;;  %v1534_v52 = vpack.c.bf16 %v271_v44, %v270_v43  ;;  %v1536_v54 = vpack.c.bf16 %v289_v49, %v288_v48 }
  0x3a   : > { %1551 = vmatpush3.bf16.msra.mxu1 %v1550_v63  ;;  %1521 = vmatprep.subr.bf16.mxu0 %v1520_v0  ;;  %v1566_v53 = vpack.c.bf16 %v303_v47, %v302_v45  ;;  %v272_v55 = vld [vmem:[%s1749_s14 + $0x260] sm:$0xff]  ;;  %v273_v56 = vld [vmem:[%s1749_s14 + $0x268] sm:$0xff]  ;;  %v1568_v58 = vpack.c.bf16 %v321_v51, %v320_v50  ;;  %v290_v60 = vld [vmem:[%s1749_s14 + $0x2f0] sm:$0xff] }
  0x3b   : > { %1553 = vmatprep.subr.bf16.mxu1 %v1552_v4  ;;  %666 = vmatprep.mubr.f32.mxu0 %v173_v32  ;;  %v304_v57 = vld [vmem:[%s1749_s14 + $0x360] sm:$0xff]  ;;  %v305_v59 = vld [vmem:[%s1749_s14 + $0x368] sm:$0xff]  ;;  %v291_v61 = vld [vmem:[%s1749_s14 + $0x2f8] sm:$0xff]  ;;  %v1538_v0 = vpack.c.bf16 %v273_v56, %v272_v55 }
  0x3c   : > { %741 = vmatprep.mubr.f32.mxu1 %v175_v33  ;;  %v322_v62 = vld [vmem:[%s1749_s14 + $0x3f0] sm:$0xff]  ;;  %v323_v63 = vld [vmem:[%s1749_s14 + $0x3f8] sm:$0xff]  ;;  %v1570_v1 = vpack.c.bf16 %v305_v59, %v304_v57  ;;  %v1540_v2 = vpack.c.bf16 %v291_v61, %v290_v60  ;;  %v340_v8 = vld [vmem:[%s1749_s14 + $0x480] sm:$0xff] }
  0x3d   : > { %1523 = vmatpush3.bf16.msra.mxu0 %v1522_v11  ;;  %v274_v3 = vld [vmem:[%s1749_s14 + $0x270] sm:$0xff]  ;;  %v275_v4 = vld [vmem:[%s1749_s14 + $0x278] sm:$0xff]  ;;  %v1572_v6 = vpack.c.bf16 %v323_v63, %v322_v62  ;;  %v341_v9 = vld [vmem:[%s1749_s14 + $0x488] sm:$0xff] }
  0x3e   : > { %1555 = vmatpush3.bf16.msra.mxu1 %v1554_v15  ;;  %1525 = vmatprep.subr.bf16.mxu0 %v1524_v16  ;;  %v306_v5 = vld [vmem:[%s1749_s14 + $0x370] sm:$0xff]  ;;  %v307_v7 = vld [vmem:[%s1749_s14 + $0x378] sm:$0xff]  ;;  %v372_v10 = vld [vmem:[%s1749_s14 + $0x580] sm:$0xff]  ;;  %v1542_v12 = vpack.c.bf16 %v275_v4, %v274_v3  ;;  %v1576_v14 = vpack.c.bf16 %v341_v9, %v340_v8 }
  0x3f   : > { %1557 = vmatprep.subr.bf16.mxu1 %v1556_v20  ;;  %v373_v11 = vld [vmem:[%s1749_s14 + $0x588] sm:$0xff]  ;;  %v1574_v13 = vpack.c.bf16 %v307_v7, %v306_v5  ;;  %v324_v15 = vld [vmem:[%s1749_s14 + $0x400] sm:$0xff]  ;;  %v342_v20 = vld [vmem:[%s1749_s14 + $0x490] sm:$0xff] }
  0x40   : > { %v325_v16 = vld [vmem:[%s1749_s14 + $0x408] sm:$0xff]  ;;  %v356_v17 = vld [vmem:[%s1749_s14 + $0x500] sm:$0xff]  ;;  %v1608_v18 = vpack.c.bf16 %v373_v11, %v372_v10  ;;  %v343_v21 = vld [vmem:[%s1749_s14 + $0x498] sm:$0xff] }
  0x41   : > { %1527 = vmatpush3.bf16.msra.mxu0 %v1526_v26  ;;  %v357_v19 = vld [vmem:[%s1749_s14 + $0x508] sm:$0xff]  ;;  %v374_v22 = vld [vmem:[%s1749_s14 + $0x590] sm:$0xff]  ;;  %v375_v23 = vld [vmem:[%s1749_s14 + $0x598] sm:$0xff]  ;;  %v1578_v26 = vpack.c.bf16 %v325_v16, %v324_v15  ;;  %v1580_v28 = vpack.c.bf16 %v343_v21, %v342_v20 }
  0x42   : > { %1559 = vmatpush3.bf16.msra.mxu1 %v1558_v29  ;;  %1529 = vmatprep.subr.bf16.mxu0 %v1528_v30  ;;  %v172_v24 = vld [vmem:[%s1805_s18 + $0x40] sm:$0xff]  ;;  %v174_v25 = vld [vmem:[%s1805_s18 + $0x50] sm:$0xff]  ;;  %v1610_v27 = vpack.c.bf16 %v357_v19, %v356_v17  ;;  %v327_v30 = vld [vmem:[%s1749_s14 + $0x418] sm:$0xff]  ;;  %v1612_v32 = vpack.c.bf16 %v375_v23, %v374_v22 }
  0x43   : > { %1561 = vmatprep.subr.bf16.mxu1 %v1560_v34  ;;  %v326_v29 = vld [vmem:[%s1749_s14 + $0x410] sm:$0xff]  ;;  %v359_v33 = vld [vmem:[%s1749_s14 + $0x518] sm:$0xff]  ;;  %v344_v34 = vld [vmem:[%s1749_s14 + $0x4a0] sm:$0xff] }
  0x44   : > { %v358_v31 = vld [vmem:[%s1749_s14 + $0x510] sm:$0xff]  ;;  %v345_v35 = vld [vmem:[%s1749_s14 + $0x4a8] sm:$0xff]  ;;  %v376_v36 = vld [vmem:[%s1749_s14 + $0x5a0] sm:$0xff]  ;;  %v1582_v39 = vpack.c.bf16 %v327_v30, %v326_v29 }
  0x45   : > { %1531 = vmatpush3.bf16.msra.mxu0 %v1530_v40  ;;  %v377_v37 = vld [vmem:[%s1749_s14 + $0x5a8] sm:$0xff]  ;;  %v328_v40 = vld [vmem:[%s1749_s14 + $0x420] sm:$0xff]  ;;  %v1614_v43 = vpack.c.bf16 %v359_v33, %v358_v31  ;;  %v1584_v44 = vpack.c.bf16 %v345_v35, %v344_v34  ;;  %v178_v47 = vld [vmem:[%s1805_s18 + $0x70] sm:$0xff] }
  0x46   : > { %1563 = vmatpush3.bf16.msra.mxu1 %v1562_v41  ;;  %1533 = vmatprep.subr.bf16.mxu0 %v1532_v42  ;;  %v177_v38 = vld [vmem:[%s1805_s18 + $0x68] sm:$0xff]  ;;  %v179_v41 = vld [vmem:[%s1805_s18 + $0x78] sm:$0xff]  ;;  %v176_v42 = vld [vmem:[%s1805_s18 + $0x60] sm:$0xff]  ;;  %v1616_v48 = vpack.c.bf16 %v377_v37, %v376_v36 }
  0x47   : > { %1565 = vmatprep.subr.bf16.mxu1 %v1564_v46  ;;  %v329_v45 = vld [vmem:[%s1749_s14 + $0x428] sm:$0xff]  ;;  %v360_v46 = vld [vmem:[%s1749_s14 + $0x520] sm:$0xff]  ;;  %v346_v50 = vld [vmem:[%s1749_s14 + $0x4b0] sm:$0xff] }
  0x48   : > { %v361_v49 = vld [vmem:[%s1749_s14 + $0x528] sm:$0xff]  ;;  %v347_v51 = vld [vmem:[%s1749_s14 + $0x4b8] sm:$0xff]  ;;  %v1586_v55 = vpack.c.bf16 %v329_v45, %v328_v40  ;;  %v330_v59 = vld [vmem:[%s1749_s14 + $0x430] sm:$0xff] }
  0x49   : > { %1535 = vmatpush3.bf16.msra.mxu0 %v1534_v52  ;;  %v378_v52 = vld [vmem:[%s1749_s14 + $0x5b0] sm:$0xff]  ;;  %v183_v56 = vld [vmem:[%s1805_s18 + $0x98] sm:$0xff]  ;;  %v1618_v57 = vpack.c.bf16 %v361_v49, %v360_v46  ;;  %v381_v3 = vld [vmem:[%s1749_s14 + $0x5c8] sm:$0xff] }
  0x4a   : > { %1567 = vmatpush3.bf16.msra.mxu1 %v1566_v53  ;;  %1537 = vmatprep.subr.bf16.mxu0 %v1536_v54  ;;  %v379_v53 = vld [vmem:[%s1749_s14 + $0x5b8] sm:$0xff]  ;;  %v181_v54 = vld [vmem:[%s1805_s18 + $0x88] sm:$0xff]  ;;  %v362_v61 = vld [vmem:[%s1749_s14 + $0x530] sm:$0xff] }
  0x4b   : > { %1569 = vmatprep.subr.bf16.mxu1 %v1568_v58  ;;  %v1588_v58 = vpack.c.bf16 %v347_v51, %v346_v50  ;;  %v331_v60 = vld [vmem:[%s1749_s14 + $0x438] sm:$0xff]  ;;  %v1620_v62 = vpack.c.bf16 %v379_v53, %v378_v52  ;;  %v332_v7 = vld [vmem:[%s1749_s14 + $0x440] sm:$0xff]  ;;  %v333_v8 = vld [vmem:[%s1749_s14 + $0x448] sm:$0xff] }
  0x4c   : > { %v363_v63 = vld [vmem:[%s1749_s14 + $0x538] sm:$0xff]  ;;  %v1590_v4 = vpack.c.bf16 %v331_v60, %v330_v59  ;;  %v364_v9 = vld [vmem:[%s1749_s14 + $0x540] sm:$0xff]  ;;  %v365_v11 = vld [vmem:[%s1749_s14 + $0x548] sm:$0xff]  ;;  %v1594_v16 = vpack.c.bf16 %v333_v8, %v332_v7 }
  0x4d   : > { %1539 = vmatpush3.bf16.msra.mxu0 %v1538_v0  ;;  %v348_v0 = vld [vmem:[%s1749_s14 + $0x4c0] sm:$0xff]  ;;  %v1622_v5 = vpack.c.bf16 %v363_v63, %v362_v61  ;;  %v383_v15 = vld [vmem:[%s1749_s14 + $0x5d8] sm:$0xff]  ;;  %v1626_v17 = vpack.c.bf16 %v365_v11, %v364_v9  ;;  %v334_v19 = vld [vmem:[%s1749_s14 + $0x450] sm:$0xff] }
  0x4e   : > { %1571 = vmatpush3.bf16.msra.mxu1 %v1570_v1  ;;  %1541 = vmatprep.subr.bf16.mxu0 %v1540_v2  ;;  %v349_v1 = vld [vmem:[%s1749_s14 + $0x4c8] sm:$0xff]  ;;  %v380_v2 = vld [vmem:[%s1749_s14 + $0x5c0] sm:$0xff]  ;;  %v335_v20 = vld [vmem:[%s1749_s14 + $0x458] sm:$0xff] }
  0x4f   : > { %1573 = vmatprep.subr.bf16.mxu1 %v1572_v6  ;;  %v1592_v6 = vpack.c.bf16 %v349_v1, %v348_v0  ;;  %v1624_v10 = vpack.c.bf16 %v381_v3, %v380_v2  ;;  %v366_v21 = vld [vmem:[%s1749_s14 + $0x550] sm:$0xff]  ;;  %v367_v23 = vld [vmem:[%s1749_s14 + $0x558] sm:$0xff]  ;;  %v336_v31 = vld [vmem:[%s1749_s14 + $0x460] sm:$0xff] }
  0x50   : > { %v1630_v29 = vpack.c.bf16 %v367_v23, %v366_v21  ;;  %v368_v33 = vld [vmem:[%s1749_s14 + $0x560] sm:$0xff]  ;;  %v369_v35 = vld [vmem:[%s1749_s14 + $0x568] sm:$0xff]  ;;  %v354_v36 = vld [vmem:[%s1749_s14 + $0x4f0] sm:$0xff] }
  0x51   : > { %1543 = vmatpush3.bf16.msra.mxu0 %v1542_v12  ;;  %v350_v12 = vld [vmem:[%s1749_s14 + $0x4d0] sm:$0xff]  ;;  %v355_v37 = vld [vmem:[%s1749_s14 + $0x4f8] sm:$0xff]  ;;  %v405_v49 = vld [vmem:[%s1749_s14 + $0x688] sm:$0xff] }
  0x52   : > { %1575 = vmatpush3.bf16.msra.mxu1 %v1574_v13  ;;  %1577 = vmatprep.subr.bf16.mxu0 %v1576_v14  ;;  %v351_v13 = vld [vmem:[%s1749_s14 + $0x4d8] sm:$0xff]  ;;  %v382_v14 = vld [vmem:[%s1749_s14 + $0x5d0] sm:$0xff]  ;;  %v436_v50 = vld [vmem:[%s1749_s14 + $0x780] sm:$0xff] }
  0x53   : > { %1609 = vmatprep.subr.bf16.mxu1 %v1608_v18  ;;  %v1596_v18 = vpack.c.bf16 %v351_v13, %v350_v12  ;;  %v1628_v22 = vpack.c.bf16 %v383_v15, %v382_v14  ;;  %v370_v45 = vld [vmem:[%s1749_s14 + $0x570] sm:$0xff]  ;;  %v437_v51 = vld [vmem:[%s1749_s14 + $0x788] sm:$0xff]  ;;  %v407_v61 = vld [vmem:[%s1749_s14 + $0x698] sm:$0xff] }
  0x54   : > { %667 = vmatmul.mubr.f32.vlgmr.msra.gmra.mrb[4].mxu0 %v172_v24  ;;  %v352_v24 = vld [vmem:[%s1749_s14 + $0x4e0] sm:$0xff]  ;;  %v421_v59 = vld [vmem:[%s1749_s14 + $0x708] sm:$0xff]  ;;  %v406_v60 = vld [vmem:[%s1749_s14 + $0x690] sm:$0xff] }
  0x55   : > { %742 = vmatmul.mubr.f32.vlgmr.msra.gmra.mrb[4].mxu1 %v174_v25  ;;  %1579 = vmatpush3.bf16.msra.mxu0 %v1578_v26  ;;  %v353_v25 = vld [vmem:[%s1749_s14 + $0x4e8] sm:$0xff]  ;;  %v384_v26 = vld [vmem:[%s1749_s14 + $0x5e0] sm:$0xff]  ;;  %v439_v63 = vld [vmem:[%s1749_s14 + $0x798] sm:$0xff] }
  0x56   : > { %1611 = vmatpush3.bf16.msra.mxu1 %v1610_v27  ;;  %1581 = vmatprep.subr.bf16.mxu0 %v1580_v28  ;;  %v385_v27 = vld [vmem:[%s1749_s14 + $0x5e8] sm:$0xff]  ;;  %v1598_v28 = vpack.c.bf16 %v335_v20, %v334_v19  ;;  %v1600_v30 = vpack.c.bf16 %v353_v25, %v352_v24  ;;  %v180_v0 = vld [vmem:[%s1805_s18 + $0x80] sm:$0xff]  ;;  %v182_v1 = vld [vmem:[%s1805_s18 + $0x90] sm:$0xff] }
  0x57   : > { %1613 = vmatprep.subr.bf16.mxu1 %v1612_v32  ;;  %671 = vmatprep.mubr.f32.mxu0 %v177_v38  ;;  %v337_v32 = vld [vmem:[%s1749_s14 + $0x468] sm:$0xff]  ;;  %v1632_v34 = vpack.c.bf16 %v385_v27, %v384_v26  ;;  %v386_v38 = vld [vmem:[%s1749_s14 + $0x5f0] sm:$0xff]  ;;  %v423_v9 = vld [vmem:[%s1749_s14 + $0x718] sm:$0xff] }
  0x58   : > { %746 = vmatprep.mubr.f32.mxu1 %v179_v41  ;;  %672 = vmatmul.mubr.f32.gmra.mrb[6].mxu0 %v176_v42  ;;  %v1602_v40 = vpack.c.bf16 %v337_v32, %v336_v31  ;;  %v1634_v41 = vpack.c.bf16 %v369_v35, %v368_v33  ;;  %v1604_v42 = vpack.c.bf16 %v355_v37, %v354_v36  ;;  %v422_v7 = vld [vmem:[%s1749_s14 + $0x710] sm:$0xff]  ;;  %v409_v11 = vld [vmem:[%s1749_s14 + $0x6a8] sm:$0xff]  ;;  %v440_v12 = vld [vmem:[%s1749_s14 + $0x7a0] sm:$0xff] }
  0x59   : > { %1583 = vmatpush3.bf16.msra.mxu0 %v1582_v39  ;;  %747 = vmatmul.mubr.f32.gmra.mrb[6].mxu1 %v178_v47  ;;  %v387_v39 = vld [vmem:[%s1749_s14 + $0x5f8] sm:$0xff]  ;;  %v441_v13 = vld [vmem:[%s1749_s14 + $0x7a8] sm:$0xff]  ;;  %v1678_v19 = vpack.c.bf16 %v423_v9, %v422_v7  ;;  %v186_v23 = vld [vmem:[%s1805_s18 + $0xb0] sm:$0xff] }
  0x5a   : > { %1615 = vmatpush3.bf16.msra.mxu1 %v1614_v43  ;;  %1585 = vmatprep.subr.bf16.mxu0 %v1584_v44  ;;  %v338_v43 = vld [vmem:[%s1749_s14 + $0x470] sm:$0xff]  ;;  %v339_v44 = vld [vmem:[%s1749_s14 + $0x478] sm:$0xff]  ;;  %v1636_v46 = vpack.c.bf16 %v387_v39, %v386_v38  ;;  %v185_v14 = vld [vmem:[%s1805_s18 + $0xa8] sm:$0xff]  ;;  %v1680_v24 = vpack.c.bf16 %v441_v13, %v440_v12 }
  0x5b   : > { %1617 = vmatprep.subr.bf16.mxu1 %v1616_v48  ;;  %816 = vmatprep.mubr.f32.mxu0 %v181_v54  ;;  %v371_v47 = vld [vmem:[%s1749_s14 + $0x578] sm:$0xff]  ;;  %v404_v48 = vld [vmem:[%s1749_s14 + $0x680] sm:$0xff]  ;;  %v1606_v52 = vpack.c.bf16 %v339_v44, %v338_v43  ;;  %v393_v21 = vld [vmem:[%s1749_s14 + $0x628] sm:$0xff] }
  0x5c   : > { %891 = vmatprep.mubr.f32.mxu1 %v183_v56  ;;  %v1638_v53 = vpack.c.bf16 %v371_v47, %v370_v45  ;;  %v1640_v54 = vpack.c.bf16 %v405_v49, %v404_v48  ;;  %v389_v56 = vld [vmem:[%s1749_s14 + $0x608] sm:$0xff]  ;;  %v410_v26 = vld [vmem:[%s1749_s14 + $0x6b0] sm:$0xff]  ;;  %v411_v27 = vld [vmem:[%s1749_s14 + $0x6b8] sm:$0xff] }
  0x5d   : > { %1587 = vmatpush3.bf16.msra.mxu0 %v1586_v55  ;;  %v388_v55 = vld [vmem:[%s1749_s14 + $0x600] sm:$0xff]  ;;  %v425_v25 = vld [vmem:[%s1749_s14 + $0x728] sm:$0xff]  ;;  %v191_v32 = vld [vmem:[%s1805_s18 + $0xd8] sm:$0xff] }
  0x5e   : > { %1619 = vmatpush3.bf16.msra.mxu1 %v1618_v57  ;;  %1589 = vmatprep.subr.bf16.mxu0 %v1588_v58  ;;  %v420_v57 = vld [vmem:[%s1749_s14 + $0x700] sm:$0xff]  ;;  %v1672_v58 = vpack.c.bf16 %v437_v51, %v436_v50  ;;  %v1642_v2 = vpack.c.bf16 %v389_v56, %v388_v55  ;;  %v394_v35 = vld [vmem:[%s1749_s14 + $0x630] sm:$0xff]  ;;  %v395_v36 = vld [vmem:[%s1749_s14 + $0x638] sm:$0xff] }
  0x5f   : > { %1621 = vmatprep.subr.bf16.mxu1 %v1620_v62  ;;  %v438_v62 = vld [vmem:[%s1749_s14 + $0x790] sm:$0xff]  ;;  %v1674_v3 = vpack.c.bf16 %v421_v59, %v420_v57  ;;  %v427_v39 = vld [vmem:[%s1749_s14 + $0x738] sm:$0xff]  ;;  %v445_v43 = vld [vmem:[%s1749_s14 + $0x7c8] sm:$0xff]  ;;  %v1654_v44 = vpack.c.bf16 %v395_v36, %v394_v35 }
  0x60   : > { %v1676_v8 = vpack.c.bf16 %v439_v63, %v438_v62  ;;  %v426_v37 = vld [vmem:[%s1749_s14 + $0x730] sm:$0xff]  ;;  %v396_v47 = vld [vmem:[%s1749_s14 + $0x640] sm:$0xff]  ;;  %v397_v48 = vld [vmem:[%s1749_s14 + $0x648] sm:$0xff] }
  0x61   : > { %1591 = vmatpush3.bf16.msra.mxu0 %v1590_v4  ;;  %v1644_v4 = vpack.c.bf16 %v407_v61, %v406_v60  ;;  %v1686_v45 = vpack.c.bf16 %v427_v39, %v426_v37  ;;  %v428_v49 = vld [vmem:[%s1749_s14 + $0x740] sm:$0xff]  ;;  %v429_v51 = vld [vmem:[%s1749_s14 + $0x748] sm:$0xff]  ;;  %v447_v55 = vld [vmem:[%s1749_s14 + $0x7d8] sm:$0xff]  ;;  %v1658_v56 = vpack.c.bf16 %v397_v48, %v396_v47 }
  0x62   : > { %1623 = vmatpush3.bf16.msra.mxu1 %v1622_v5  ;;  %1593 = vmatprep.subr.bf16.mxu0 %v1592_v6  ;;  %v390_v5 = vld [vmem:[%s1749_s14 + $0x610] sm:$0xff]  ;;  %v391_v6 = vld [vmem:[%s1749_s14 + $0x618] sm:$0xff]  ;;  %v1690_v57 = vpack.c.bf16 %v429_v51, %v428_v49  ;;  %v400_v7 = vld [vmem:[%s1749_s14 + $0x660] sm:$0xff] }
  0x63   : > { %1625 = vmatprep.subr.bf16.mxu1 %v1624_v10  ;;  %v408_v10 = vld [vmem:[%s1749_s14 + $0x6a0] sm:$0xff]  ;;  %v1646_v15 = vpack.c.bf16 %v391_v6, %v390_v5  ;;  %v398_v59 = vld [vmem:[%s1749_s14 + $0x650] sm:$0xff]  ;;  %v399_v60 = vld [vmem:[%s1749_s14 + $0x658] sm:$0xff] }
  0x64   : > { %v1648_v20 = vpack.c.bf16 %v409_v11, %v408_v10  ;;  %v430_v61 = vld [vmem:[%s1749_s14 + $0x750] sm:$0xff]  ;;  %v431_v63 = vld [vmem:[%s1749_s14 + $0x758] sm:$0xff]  ;;  %v432_v9 = vld [vmem:[%s1749_s14 + $0x760] sm:$0xff] }
  0x65   : > { %1595 = vmatpush3.bf16.msra.mxu0 %v1594_v16  ;;  %v392_v16 = vld [vmem:[%s1749_s14 + $0x620] sm:$0xff]  ;;  %v1694_v5 = vpack.c.bf16 %v431_v63, %v430_v61  ;;  %v433_v11 = vld [vmem:[%s1749_s14 + $0x768] sm:$0xff]  ;;  %v418_v12 = vld [vmem:[%s1749_s14 + $0x6f0] sm:$0xff] }
  0x66   : > { %1627 = vmatpush3.bf16.msra.mxu1 %v1626_v17  ;;  %1597 = vmatprep.subr.bf16.mxu0 %v1596_v18  ;;  %v187_v17 = vld [vmem:[%s1805_s18 + $0xb8] sm:$0xff]  ;;  %v184_v18 = vld [vmem:[%s1805_s18 + $0xa0] sm:$0xff]  ;;  %v1650_v31 = vpack.c.bf16 %v393_v21, %v392_v16 }
  0x67   : > { %1629 = vmatprep.subr.bf16.mxu1 %v1628_v22  ;;  %v424_v22 = vld [vmem:[%s1749_s14 + $0x720] sm:$0xff]  ;;  %v419_v13 = vld [vmem:[%s1749_s14 + $0x6f8] sm:$0xff] }
  0x68   : > { %v1682_v33 = vpack.c.bf16 %v425_v25, %v424_v22  ;;  %v434_v22 = vld [vmem:[%s1749_s14 + $0x770] sm:$0xff] }
  0x69   : > { %1599 = vmatpush3.bf16.msra.mxu0 %v1598_v28  ;;  %v442_v28 = vld [vmem:[%s1749_s14 + $0x7b0] sm:$0xff] }
  0x6a   : > { %1631 = vmatpush3.bf16.msra.mxu1 %v1630_v29  ;;  %1601 = vmatprep.subr.bf16.mxu0 %v1600_v30  ;;  %v443_v29 = vld [vmem:[%s1749_s14 + $0x7b8] sm:$0xff]  ;;  %v189_v30 = vld [vmem:[%s1805_s18 + $0xc8] sm:$0xff] }
  0x6b   : > { %1633 = vmatprep.subr.bf16.mxu1 %v1632_v34  ;;  %v1652_v34 = vpack.c.bf16 %v411_v27, %v410_v26  ;;  %v1684_v38 = vpack.c.bf16 %v443_v29, %v442_v28  ;;  %v188_v26 = vld [vmem:[%s1805_s18 + $0xc0] sm:$0xff]  ;;  %v190_v27 = vld [vmem:[%s1805_s18 + $0xd0] sm:$0xff]  ;;  %v193_v28 = vld [vmem:[%s1805_s18 + $0xe8] sm:$0xff] }
  0x6c   : > { %v195_v29 = vld [vmem:[%s1805_s18 + $0xf8] sm:$0xff] }
  0x6d   : > { %1603 = vmatpush3.bf16.msra.mxu0 %v1602_v40  ;;  %v412_v40 = vld [vmem:[%s1749_s14 + $0x6c0] sm:$0xff] }
  0x6e   : > { %1635 = vmatpush3.bf16.msra.mxu1 %v1634_v41  ;;  %1605 = vmatprep.subr.bf16.mxu0 %v1604_v42  ;;  %v413_v41 = vld [vmem:[%s1749_s14 + $0x6c8] sm:$0xff]  ;;  %v444_v42 = vld [vmem:[%s1749_s14 + $0x7c0] sm:$0xff] }
  0x6f   : > { %1637 = vmatprep.subr.bf16.mxu1 %v1636_v46  ;;  %v1656_v46 = vpack.c.bf16 %v413_v41, %v412_v40  ;;  %v1688_v50 = vpack.c.bf16 %v445_v43, %v444_v42 }
  0x71   : > { %1607 = vmatpush3.bf16.msra.mxu0 %v1606_v52  ;;  %v414_v52 = vld [vmem:[%s1749_s14 + $0x6d0] sm:$0xff] }
  0x72   : > { %1639 = vmatpush3.bf16.msra.mxu1 %v1638_v53  ;;  %1641 = vmatprep.subr.bf16.mxu0 %v1640_v54  ;;  %v415_v53 = vld [vmem:[%s1749_s14 + $0x6d8] sm:$0xff]  ;;  %v446_v54 = vld [vmem:[%s1749_s14 + $0x7d0] sm:$0xff] }
  0x73   : > { %1673 = vmatprep.subr.bf16.mxu1 %v1672_v58  ;;  %v1660_v58 = vpack.c.bf16 %v415_v53, %v414_v52  ;;  %v1692_v62 = vpack.c.bf16 %v447_v55, %v446_v54 }
  0x74   : > { %817 = vmatmul.mubr.f32.vlgmr.msra.gmra.mrb[8].mxu0 %v180_v0  ;;  %v416_v0 = vld [vmem:[%s1749_s14 + $0x6e0] sm:$0xff] }
  0x75   : > { %892 = vmatmul.mubr.f32.vlgmr.msra.gmra.mrb[8].mxu1 %v182_v1  ;;  %1643 = vmatpush3.bf16.msra.mxu0 %v1642_v2  ;;  %v417_v1 = vld [vmem:[%s1749_s14 + $0x6e8] sm:$0xff]  ;;  %v448_v2 = vld [vmem:[%s1749_s14 + $0x7e0] sm:$0xff] }
  0x76   : > { %1675 = vmatpush3.bf16.msra.mxu1 %v1674_v3  ;;  %1645 = vmatprep.subr.bf16.mxu0 %v1644_v4  ;;  %v449_v3 = vld [vmem:[%s1749_s14 + $0x7e8] sm:$0xff]  ;;  %v1662_v4 = vpack.c.bf16 %v399_v60, %v398_v59  ;;  %v1664_v6 = vpack.c.bf16 %v417_v1, %v416_v0 }
  0x77   : > { %1677 = vmatprep.subr.bf16.mxu1 %v1676_v8  ;;  %821 = vmatprep.mubr.f32.mxu0 %v185_v14  ;;  %v401_v8 = vld [vmem:[%s1749_s14 + $0x668] sm:$0xff]  ;;  %v1696_v10 = vpack.c.bf16 %v449_v3, %v448_v2  ;;  %v450_v14 = vld [vmem:[%s1749_s14 + $0x7f0] sm:$0xff] }
  0x78   : > { %896 = vmatprep.mubr.f32.mxu1 %v187_v17  ;;  %822 = vmatmul.mubr.f32.gmra.mrb[10].mxu0 %v184_v18  ;;  %v1666_v16 = vpack.c.bf16 %v401_v8, %v400_v7  ;;  %v1698_v17 = vpack.c.bf16 %v433_v11, %v432_v9  ;;  %v1668_v18 = vpack.c.bf16 %v419_v13, %v418_v12 }
  0x79   : > { %1647 = vmatpush3.bf16.msra.mxu0 %v1646_v15  ;;  %897 = vmatmul.mubr.f32.gmra.mrb[10].mxu1 %v186_v23  ;;  %v451_v15 = vld [vmem:[%s1749_s14 + $0x7f8] sm:$0xff] }
  0x7a   : > { %1679 = vmatpush3.bf16.msra.mxu1 %v1678_v19  ;;  %1649 = vmatprep.subr.bf16.mxu0 %v1648_v20  ;;  %v402_v19 = vld [vmem:[%s1749_s14 + $0x670] sm:$0xff]  ;;  %v403_v20 = vld [vmem:[%s1749_s14 + $0x678] sm:$0xff]  ;;  %v1700_v21 = vpack.c.bf16 %v451_v15, %v450_v14 }
  0x7b   : > { %1681 = vmatprep.subr.bf16.mxu1 %v1680_v24  ;;  %966 = vmatprep.mubr.f32.mxu0 %v189_v30  ;;  %v435_v23 = vld [vmem:[%s1749_s14 + $0x778] sm:$0xff]  ;;  %v1670_v24 = vpack.c.bf16 %v403_v20, %v402_v19  ;;  %v192_v30 = vld [vmem:[%s1805_s18 + $0xe0] sm:$0xff] }
  0x7c   : > { %1041 = vmatprep.mubr.f32.mxu1 %v191_v32  ;;  %v1702_v25 = vpack.c.bf16 %v435_v23, %v434_v22 }
  0x7d   : > { %1651 = vmatpush3.bf16.msra.mxu0 %v1650_v31  ;;  %v194_v31 = vld [vmem:[%s1805_s18 + $0xf0] sm:$0xff] }
  0x7e   : > { %1683 = vmatpush3.bf16.msra.mxu1 %v1682_v33  ;;  %1653 = vmatprep.subr.bf16.mxu0 %v1652_v34 }
  0x7f   : > { %1685 = vmatprep.subr.bf16.mxu1 %v1684_v38 }
  0x81   : > { %1655 = vmatpush3.bf16.msra.mxu0 %v1654_v44 }
  0x82   : > { %1687 = vmatpush3.bf16.msra.mxu1 %v1686_v45  ;;  %1657 = vmatprep.subr.bf16.mxu0 %v1656_v46 }
  0x83   : > { %1689 = vmatprep.subr.bf16.mxu1 %v1688_v50 }
  0x85   : > { %1659 = vmatpush3.bf16.msra.mxu0 %v1658_v56 }
  0x86   : > { %1691 = vmatpush3.bf16.msra.mxu1 %v1690_v57  ;;  %1661 = vmatprep.subr.bf16.mxu0 %v1660_v58 }
  0x87   : > { %1693 = vmatprep.subr.bf16.mxu1 %v1692_v62 }
  0x89   : > { %1663 = vmatpush3.bf16.msra.mxu0 %v1662_v4 }
  0x8a   : > { %1695 = vmatpush3.bf16.msra.mxu1 %v1694_v5  ;;  %1665 = vmatprep.subr.bf16.mxu0 %v1664_v6 }
  0x8b   : > { %1697 = vmatprep.subr.bf16.mxu1 %v1696_v10 }
  0x8d   : > { %1667 = vmatpush3.bf16.msra.mxu0 %v1666_v16 }
  0x8e   : > { %1699 = vmatpush3.bf16.msra.mxu1 %v1698_v17  ;;  %1669 = vmatprep.subr.bf16.mxu0 %v1668_v18 }
  0x8f   : > { %1701 = vmatprep.subr.bf16.mxu1 %v1700_v21 }
  0x91   : > { %1671 = vmatpush3.bf16.msra.mxu0 %v1670_v24 }
  0x92   : > { %1703 = vmatpush3.bf16.msra.mxu1 %v1702_v25 }
  0x94   : > { %967 = vmatmul.mubr.f32.vlgmr.msra.gmra.mrb[12].mxu0 %v188_v26 }
  0x95   : > { %1042 = vmatmul.mubr.f32.vlgmr.msra.gmra.mrb[12].mxu1 %v190_v27  ;;  %971 = vmatprep.mubr.f32.mxu0 %v193_v28 }
  0x96   : > { %1046 = vmatprep.mubr.f32.mxu1 %v195_v29 }
  0x98   : > { %972 = vmatmul.mubr.f32.gmra.mrb[14].mxu0 %v192_v30 }
  0x99   : > { %1047 = vmatmul.mubr.f32.gmra.mrb[14].mxu1 %v194_v31 }
 0x107   : > { %v1176_v32 = vpop.f32.mrb[0].mxu0 }
 0x108   : > { %v1214_v33 = vpop.f32.mrb[0].mxu1  ;;  %v1177_v34 = vpop.f32.mrb[1].mxu0 }
 0x109   : > { %v1178_v35 = vadd.f32 %v1177_v34, %v1176_v32  ;;  %v1215_v36 = vpop.f32.mrb[1].mxu1 }
 0x10a   : > { %v1216_v37 = vadd.f32 %v1215_v36, %v1214_v33 }
 0x10b   : > { %v1179_v39 = vpop.f32.mrb[2].mxu0 }
 0x10c   : > { %v594_v38 = vadd.f32 %v1216_v37, %v1178_v35  ;;  %v1217_v40 = vpop.f32.mrb[2].mxu1  ;;  %v1180_v41 = vpop.f32.mrb[3].mxu0 }
 0x10d   : > { %v1181_v42 = vadd.f32 %v1180_v41, %v1179_v39  ;;  %v1218_v43 = vpop.f32.mrb[3].mxu1 }
 0x10e   : > { %1053 = vst.msk [vmem:[%s2049_s22] sm:$0xff] %vm1052_vm0, %v594_v38  ;;  %v1219_v44 = vadd.f32 %v1218_v43, %v1217_v40 }
 0x110   : > { %v599_v45 = vadd.f32 %v1219_v44, %v1181_v42 }
 0x112   : > { %1054 = vst.msk [vmem:[%s2049_s22 + $0x8] sm:$0xff] %vm1052_vm0, %v599_v45 }
 0x127   : > { %v1252_v46 = vpop.f32.mrb[4].mxu0 }
 0x128   : > { %v1290_v47 = vpop.f32.mrb[4].mxu1  ;;  %v1253_v48 = vpop.f32.mrb[5].mxu0 }
 0x129   : > { %v1254_v49 = vadd.f32 %v1253_v48, %v1252_v46  ;;  %v1291_v50 = vpop.f32.mrb[5].mxu1 }
 0x12a   : > { %v1292_v51 = vadd.f32 %v1291_v50, %v1290_v47 }
 0x12b   : > { %v1255_v52 = vpop.f32.mrb[6].mxu0 }
 0x12c   : > { %v744_v53 = vadd.f32 %v1292_v51, %v1254_v49  ;;  %v1293_v54 = vpop.f32.mrb[6].mxu1  ;;  %v1256_v55 = vpop.f32.mrb[7].mxu0 }
 0x12d   : > { %v1257_v56 = vadd.f32 %v1256_v55, %v1255_v52  ;;  %v1294_v57 = vpop.f32.mrb[7].mxu1 }
 0x12e   : > { %1055 = vst.msk [vmem:[%s2049_s22 + $0x10] sm:$0xff] %vm1052_vm0, %v744_v53  ;;  %v1295_v58 = vadd.f32 %v1294_v57, %v1293_v54 }
 0x130   : > { %v749_v59 = vadd.f32 %v1295_v58, %v1257_v56 }
 0x132   : > { %1056 = vst.msk [vmem:[%s2049_s22 + $0x18] sm:$0xff] %vm1052_vm0, %v749_v59 }
 0x147   : > { %v1328_v60 = vpop.f32.mrb[8].mxu0 }
 0x148   : > { %v1366_v61 = vpop.f32.mrb[8].mxu1  ;;  %v1329_v62 = vpop.f32.mrb[9].mxu0 }
 0x149   : > { %v1330_v63 = vadd.f32 %v1329_v62, %v1328_v60  ;;  %v1367_v0 = vpop.f32.mrb[9].mxu1 }
 0x14a   : > { %v1368_v1 = vadd.f32 %v1367_v0, %v1366_v61 }
 0x14b   : > { %v1331_v2 = vpop.f32.mrb[10].mxu0 }
 0x14c   : > { %v894_v3 = vadd.f32 %v1368_v1, %v1330_v63  ;;  %v1369_v4 = vpop.f32.mrb[10].mxu1  ;;  %v1332_v5 = vpop.f32.mrb[11].mxu0 }
 0x14d   : > { %v1333_v6 = vadd.f32 %v1332_v5, %v1331_v2  ;;  %v1370_v7 = vpop.f32.mrb[11].mxu1 }
 0x14e   : > { %1057 = vst.msk [vmem:[%s2049_s22 + $0x20] sm:$0xff] %vm1052_vm0, %v894_v3  ;;  %v1371_v8 = vadd.f32 %v1370_v7, %v1369_v4 }
 0x150   : > { %v899_v9 = vadd.f32 %v1371_v8, %v1333_v6 }
 0x152   : > { %1058 = vst.msk [vmem:[%s2049_s22 + $0x28] sm:$0xff] %vm1052_vm0, %v899_v9 }
 0x167   : > { %v1404_v10 = vpop.f32.mrb[12].mxu0 }
 0x168   : > { %v1442_v11 = vpop.f32.mrb[12].mxu1  ;;  %v1405_v12 = vpop.f32.mrb[13].mxu0 }
 0x169   : > { %v1406_v13 = vadd.f32 %v1405_v12, %v1404_v10  ;;  %v1443_v14 = vpop.f32.mrb[13].mxu1 }
 0x16a   : > { %v1444_v15 = vadd.f32 %v1443_v14, %v1442_v11 }
 0x16b   : > { %v1407_v16 = vpop.f32.mrb[14].mxu0 }
 0x16c   : > { %v1044_v17 = vadd.f32 %v1444_v15, %v1406_v13  ;;  %v1445_v18 = vpop.f32.mrb[14].mxu1  ;;  %v1408_v19 = vpop.f32.mrb[15].mxu0 }
 0x16d   : > { %v1409_v20 = vadd.f32 %v1408_v19, %v1407_v16  ;;  %v1446_v21 = vpop.f32.mrb[15].mxu1 }
 0x16e   : > { %1059 = vst.msk [vmem:[%s2049_s22 + $0x30] sm:$0xff] %vm1052_vm0, %v1044_v17  ;;  %v1447_v22 = vadd.f32 %v1446_v21, %v1445_v18 }
 0x170   : > { %v1049_v23 = vadd.f32 %v1447_v22, %v1409_v20 }
 0x172   : > { %1060 = vst.msk [vmem:[%s2049_s22 + $0x38] sm:$0xff] %vm1052_vm0, %v1049_v23 }
 0x173 PF: > { %s12_s9 = sadd.s32 1, %s1718_s9  }
 0x174   : > { %p9_p4 = scmp.ge.s32.totalorder %s12_s9, 4  }
 0x176   :  { %11 = sbr.rel (!%p9_p4) target bundleno = 1 (0x1), region = 61 }

// kernel: _forward_impl.5
= control target key start
LH: loop header
LB: loop body
LE: loop exit
PB: predicated region body
PF: predicated region fallthrough
CT: control target
= control target key end

     0   :  { %s448_s9 = smov 0   ;;  %s507_s0 = inlined_call_operand.vmem [shape: f32[2,4,256], index: 0, kind: input, shape index: {}]   ;;  %s508_s1 = inlined_call_operand.vmem [shape: f32[2,256,36], index: 1, kind: input, shape index: {}]   ;;  %s509_s2 = inlined_call_operand.vmem [shape: f32[2,4,36], index: 2, kind: output, shape index: {}]  }
   0x1 LB: > { %s335_s10 = sadd.s32 4294967295, %s431_s9   ;;  %p339_p0 = scmp.ge.s32.totalorder %s431_s9, 1  ;;  %s431_s9 = sphi %s448_s9, %s12_s9  }
   0x2   : > { %p122_p1 = scmp.lt.s32.totalorder %s431_s9, 3 }
   0x4   : > { %p123_p2 = pnand %p339_p0, %p122_p1 }
   0x5   : > { %p148_p3 = scmp.lt.s32.totalorder (!%p123_p2), %s335_s10, 1  ;;  %vm268_vm0 = vcmask (!%p123_p2), 289792  }
   0x6   : > { %126 = sbr.rel (%p123_p2) target bundleno = 267 (0x10b), region = 28 }
   0xd   : > { %s511_s10 = smov (!%p148_p3, %s335_s10), 1 }
   0xe   : > { %s348_s11 = sshll.u32 %s511_s10, 8  ;;  %s347_s15 = sshll.u32 %s511_s10, 3 }
   0xf   : > { %s462_s14 = scalar_lea.vmem %s508_s1, %s348_s11  ;;  %s152_s18 = scalar_lea.vmem %s507_s0, %s347_s15 }
  0x10   : > { %v179_v0 = vld [vmem:[%s462_s14 + $0x80] sm:$0xff]  ;;  %v180_v1 = vld [vmem:[%s462_s14 + $0x88] sm:$0xff]  ;;  %v181_v5 = vld [vmem:[%s462_s14 + $0x90] sm:$0xff]  ;;  %s344_s19 = sshll.u32 %s511_s10, 2 }
  0x11   : > { %v163_v2 = vld [vmem:[%s462_s14] sm:$0xff]  ;;  %v384_v3 = vpack.c.bf16 %v180_v1, %v179_v0  ;;  %v164_v4 = vld [vmem:[%s462_s14 + $0x8] sm:$0xff]  ;;  %v182_v6 = vld [vmem:[%s462_s14 + $0x98] sm:$0xff]  ;;  %s161_s22 = scalar_lea.vmem %s509_s2, %s344_s19 }
  0x12   : > { %v386_v7 = vpack.c.bf16 %v164_v4, %v163_v2  ;;  %v388_v8 = vpack.c.bf16 %v182_v6, %v181_v5  ;;  %v165_v9 = vld [vmem:[%s462_s14 + $0x10] sm:$0xff]  ;;  %v166_v10 = vld [vmem:[%s462_s14 + $0x18] sm:$0xff]  ;;  %v183_v11 = vld [vmem:[%s462_s14 + $0xa0] sm:$0xff] }
  0x13   : > { %385 = vmatprep.subr.bf16.mxu0 %v384_v3  ;;  %v184_v12 = vld [vmem:[%s462_s14 + $0xa8] sm:$0xff]  ;;  %v390_v13 = vpack.c.bf16 %v166_v10, %v165_v9  ;;  %v167_v15 = vld [vmem:[%s462_s14 + $0x20] sm:$0xff]  ;;  %v185_v17 = vld [vmem:[%s462_s14 + $0xb0] sm:$0xff] }
  0x14   : > { %387 = vmatpush3.bf16.msra.mxu0 %v386_v7  ;;  %v392_v14 = vpack.c.bf16 %v184_v12, %v183_v11  ;;  %v168_v16 = vld [vmem:[%s462_s14 + $0x28] sm:$0xff]  ;;  %v186_v18 = vld [vmem:[%s462_s14 + $0xb8] sm:$0xff]  ;;  %v169_v21 = vld [vmem:[%s462_s14 + $0x30] sm:$0xff] }
  0x15   : > { %389 = vmatprep.subr.bf16.mxu0 %v388_v8  ;;  %v394_v19 = vpack.c.bf16 %v168_v16, %v167_v15  ;;  %v396_v20 = vpack.c.bf16 %v186_v18, %v185_v17  ;;  %v170_v22 = vld [vmem:[%s462_s14 + $0x38] sm:$0xff]  ;;  %v187_v23 = vld [vmem:[%s462_s14 + $0xc0] sm:$0xff]  ;;  %v188_v24 = vld [vmem:[%s462_s14 + $0xc8] sm:$0xff] }
  0x16   : > { %v162_v25 = vld [vmem:[%s152_s18] sm:$0xff]  ;;  %v398_v27 = vpack.c.bf16 %v170_v22, %v169_v21  ;;  %v400_v28 = vpack.c.bf16 %v188_v24, %v187_v23  ;;  %v172_v30 = vld [vmem:[%s462_s14 + $0x48] sm:$0xff]  ;;  %v189_v31 = vld [vmem:[%s462_s14 + $0xd0] sm:$0xff] }
  0x17   : > { %v196_v26 = vcombine.high %v162_v25, %v162_v25  ;;  %v171_v29 = vld [vmem:[%s462_s14 + $0x40] sm:$0xff]  ;;  %v190_v32 = vld [vmem:[%s462_s14 + $0xd8] sm:$0xff]  ;;  %v173_v35 = vld [vmem:[%s462_s14 + $0x50] sm:$0xff] }
  0x18   : > { %391 = vmatpush3.bf16.msra.mxu0 %v390_v13  ;;  %v402_v33 = vpack.c.bf16 %v172_v30, %v171_v29  ;;  %v404_v34 = vpack.c.bf16 %v190_v32, %v189_v31  ;;  %v174_v36 = vld [vmem:[%s462_s14 + $0x58] sm:$0xff]  ;;  %v191_v37 = vld [vmem:[%s462_s14 + $0xe0] sm:$0xff]  ;;  %v192_v38 = vld [vmem:[%s462_s14 + $0xe8] sm:$0xff] }
  0x19   : > { %393 = vmatprep.subr.bf16.mxu0 %v392_v14  ;;  %262 = vmatprep.mubr.f32.mxu0 %v196_v26  ;;  %v406_v39 = vpack.c.bf16 %v174_v36, %v173_v35  ;;  %v408_v40 = vpack.c.bf16 %v192_v38, %v191_v37  ;;  %v175_v41 = vld [vmem:[%s462_s14 + $0x60] sm:$0xff]  ;;  %v176_v42 = vld [vmem:[%s462_s14 + $0x68] sm:$0xff]  ;;  %v193_v43 = vld [vmem:[%s462_s14 + $0xf0] sm:$0xff] }
  0x1a   : > { %v194_v44 = vld [vmem:[%s462_s14 + $0xf8] sm:$0xff]  ;;  %v410_v45 = vpack.c.bf16 %v176_v42, %v175_v41  ;;  %v177_v47 = vld [vmem:[%s462_s14 + $0x70] sm:$0xff] }
  0x1b   : > { %v412_v46 = vpack.c.bf16 %v194_v44, %v193_v43  ;;  %v178_v48 = vld [vmem:[%s462_s14 + $0x78] sm:$0xff] }
  0x1c   : > { %395 = vmatpush3.bf16.msra.mxu0 %v394_v19  ;;  %v414_v49 = vpack.c.bf16 %v178_v48, %v177_v47 }
  0x1d   : > { %397 = vmatprep.subr.bf16.mxu0 %v396_v20 }
  0x20   : > { %399 = vmatpush3.bf16.msra.mxu0 %v398_v27 }
  0x21   : > { %401 = vmatprep.subr.bf16.mxu0 %v400_v28 }
  0x24   : > { %403 = vmatpush3.bf16.msra.mxu0 %v402_v33 }
  0x25   : > { %405 = vmatprep.subr.bf16.mxu0 %v404_v34 }
  0x28   : > { %407 = vmatpush3.bf16.msra.mxu0 %v406_v39 }
  0x29   : > { %409 = vmatprep.subr.bf16.mxu0 %v408_v40 }
  0x2c   : > { %411 = vmatpush3.bf16.msra.mxu0 %v410_v45 }
  0x2d   : > { %413 = vmatprep.subr.bf16.mxu0 %v412_v46 }
  0x30   : > { %415 = vmatpush3.bf16.msra.mxu0 %v414_v49 }
  0x33   : > { %263 = vmatmul.mubr.f32.vlgmr.msra.gmra.mrb[0].mxu0 %v162_v25 }
 0x106   : > { %v381_v50 = vpop.f32.mrb[0].mxu0 }
 0x107   : > { %v382_v51 = vpop.f32.mrb[1].mxu0 }
 0x108   : > { %v383_v52 = vadd.f32 %v382_v51, %v381_v50 }
 0x10a   : > { %269 = vst.msk [vmem:[%s161_s22] sm:$0xf] %vm268_vm0, %v383_v52 }
 0x10b PF: > { %s12_s9 = sadd.s32 1, %s431_s9  }
 0x10c   : > { %p9_p4 = scmp.ge.s32.totalorder %s12_s9, 4  }
 0x10e   :  { %11 = sbr.rel (!%p9_p4) target bundleno = 1 (0x1), region = 61 }

</bundles_post_ra>
